<compile_context>
chip_gen: v7x
topology: tpu7x:2x2x1
jax: 0.10.0
libtpu: 0.0.40
codegen_flags: <defaults>
</compile_context>

<pallas_src>
import math
import functools

import jax
import jax.numpy as jnp
from jax.experimental import pallas as pl
from jax.experimental.pallas import tpu as pltpu


def _mha_kernel(x_ref, wqkv_ref, bqkv_ref, wo_ref, bo_ref, out_ref, *, heads, hidden):
    Bt, N, Din = x_ref.shape
    H = hidden
    d = H // heads
    cdtype = x_ref.dtype          # MXU operand dtype (bf16 fast path when inputs are bf16)

    # ---- fused QKV projection: one wide MXU matmul over all rows of the batch block ----
    x2d = x_ref[...].reshape(Bt * N, Din)                       # (Bt*N, Din), input dtype
    qkv = jnp.dot(x2d, wqkv_ref[...], preferred_element_type=jnp.float32)
    qkv = qkv + bqkv_ref[0][None, :]                            # (Bt*N, 3H) f32
    # NOTE: 1/sqrt(d) already folded into the Q columns of wqkv/bqkv at prep time.

    # ---- split heads: 'b n (h d) -> (b h) n d' (operands already cast to cdtype so the
    #      relayout moves narrow data and the attention dots hit the fast MXU path) ----
    def to_heads(t):                                            # (Bt*N, H) -> (Bt*heads, N, d)
        t = t.reshape(Bt, N, heads, d)
        t = jnp.transpose(t, (0, 2, 1, 3))
        return t.reshape(Bt * heads, N, d)

    q = to_heads(qkv[:, 0:H].astype(cdtype))
    k = to_heads(qkv[:, H:2 * H].astype(cdtype))
    v = to_heads(qkv[:, 2 * H:3 * H].astype(cdtype))

    # ---- attention: all heads batched in single dot_generals (no per-head Python loop) ----
    scores = jnp.einsum("bnd,bmd->bnm", q, k,
                        preferred_element_type=jnp.float32)     # (Bt*heads, N, N) f32
    m = jnp.max(scores, axis=-1, keepdims=True)
    e = jnp.exp(scores - m)
    denom = jnp.sum(e, axis=-1, keepdims=True)                  # (Bt*heads, N, 1) f32

    # Deferred normalization: scale the (N, d)-sized AV result, not the (N, N) weights.
    o = jnp.einsum("bnm,bmd->bnd", e.astype(cdtype), v,
                   preferred_element_type=jnp.float32)          # (Bt*heads, N, d) f32
    o = (o * pl.reciprocal(denom, approx=True)).astype(cdtype)  # softmax denom on the EUP

    # ---- merge heads '(b h) n d -> b n (h d)' and apply W_out as one MXU matmul ----
    o = o.reshape(Bt, heads, N, d)
    o = jnp.transpose(o, (0, 2, 1, 3)).reshape(Bt * N, H)
    out = jnp.dot(o, wo_ref[...], preferred_element_type=jnp.float32)
    out = out + bo_ref[0][None, :]                              # (Bt*N, Hp) f32

    out_ref[...] = out.reshape(Bt, N, out_ref.shape[-1]).astype(out_ref.dtype)


def prepare_params(params, heads, dtype):
    """One-time parameter prep: fuse Q/K/V, fold 1/sqrt(d) into Q, cast matmul weights to
    the activation dtype, lane-pad W_out/b_out to a multiple of 128 for a dense vst."""
    H = params["wq"].shape[1]
    assert H % heads == 0
    d = H // heads
    scale = 1.0 / math.sqrt(d)

    wqkv = jnp.concatenate([params["wq"] * scale, params["wk"], params["wv"]],
                           axis=1).astype(dtype)                       # (Din, 3H)
    bqkv = jnp.concatenate([params["bq"] * scale, params["bk"], params["bv"]],
                           axis=1).astype(jnp.float32)                 # (1, 3H), f32 bias add

    LANE = 128
    Hp = -(-H // LANE) * LANE
    wo = params["wo"].astype(dtype)
    bo = params["bo"].astype(jnp.float32)
    if Hp != H:
        wo = jnp.pad(wo, ((0, 0), (0, Hp - H)))
        bo = jnp.pad(bo, ((0, 0), (0, Hp - H)))
    return dict(wqkv=wqkv, bqkv=bqkv, wo=wo, bo=bo, H=H, Hp=Hp)


def multi_heads_atten_vit(x, prep, heads):
    """x: (B, N, Din).  prep: output of prepare_params."""
    B, N, Din = x.shape
    H, Hp = prep["H"], prep["Hp"]
    wqkv, bqkv, wo, bo = prep["wqkv"], prep["bqkv"], prep["wo"], prep["bo"]

    # ---- generation-aware VMEM budget & batch-block size ----
    try:
        vmem_cap = int(getattr(pltpu.get_tpu_info(), "vmem_capacity_bytes", 64 << 20))
    except Exception:
        vmem_cap = 64 << 20                       # conservative (v7x-sized) fallback
    if vmem_cap >= (96 << 20):                    # v5e / v6e: 128 MiB VMEM
        vmem_limit = 100 << 20
        rows_target = 1024                        # multiple-of-256 M tiles for the MXU
    else:                                         # v7x: 64 MiB per TensorCore
        vmem_limit = 56 << 20
        rows_target = 256

    in_bytes = jnp.dtype(x.dtype).itemsize
    w_bytes = jnp.dtype(wqkv.dtype).itemsize

    def vmem_estimate(bt):
        rows = bt * N
        weights = (Din * 3 * H + H * Hp) * w_bytes * 2 + (3 * H + Hp) * 4 * 2
        io = (rows * Din * in_bytes + rows * Hp * in_bytes) * 2          # double-buffered
        inter = (rows * 3 * H * (4 + in_bytes)                            # qkv f32 + casts
                 + bt * heads * N * N * (8 + in_bytes)                    # scores + e (+cast)
                 + rows * (H + Hp) * 4)                                   # o, out accum
        return int((weights + io + inter) * 1.3)

    bt = max(1, min(B, rows_target // max(N, 1)))
    if B >= 2:
        bt = min(bt, max(1, B // 2))      # keep >=2 grid steps (v7x megacore / pipelining)
    while bt > 1 and vmem_estimate(bt) > int(0.8 * vmem_limit):
        bt -= 1
    while B % bt != 0:                    # fall back to a divisor of B
        bt -= 1
    grid = (B // bt,)

    kernel = functools.partial(_mha_kernel, heads=heads, hidden=H)

    def run(single_buffer_weights):
        if single_buffer_weights:
            wspec = lambda shape: pl.BlockSpec(shape, lambda b: (0, 0),
                                               pipeline_mode=pl.Buffered(1))
        else:
            wspec = lambda shape: pl.BlockSpec(shape, lambda b: (0, 0))
        return pl.pallas_call(
            kernel,
            out_shape=jax.ShapeDtypeStruct((B, N, Hp), x.dtype),
            grid_spec=pltpu.PrefetchScalarGridSpec(
                num_scalar_prefetch=0,
                grid=grid,
                in_specs=[
                    pl.BlockSpec((bt, N, Din), lambda b: (b, 0, 0)),   # X, bt batches / step
                    wspec((Din, 3 * H)),                               # fused W_qkv (scaled Q)
                    wspec((1, 3 * H)),                                 # fused b_qkv
                    wspec((H, Hp)),                                    # W_out (lane-padded)
                    wspec((1, Hp)),                                    # b_out (lane-padded)
                ],
                out_specs=pl.BlockSpec((bt, N, Hp), lambda b: (b, 0, 0)),
            ),
            compiler_params=pltpu.CompilerParams(
                dimension_semantics=("parallel",),
                vmem_limit_bytes=vmem_limit,
            ),
        )(x, wqkv, bqkv, wo, bo)

    try:
        out = run(True)
    except Exception:
        # Fallback for Pallas builds that reject pipeline_mode=pl.Buffered(1) on
        # grid-constant operands: identical semantics, default double-buffered weights.
        out = run(False)

    return out[..., :H] if Hp != H else out


def _init_params(key, q_size, k_size, v_size, num_hiddens):
    """Deterministic init mimicking nn.Linear default (uniform +/- 1/sqrt(fan_in)).
    Weights stored already transposed to (in, out); biases as (1, out)."""
    keys = jax.random.split(key, 8)
    def lin(kw, kb, fan_in, fan_out):
        bound = 1.0 / math.sqrt(fan_in)
        w = jax.random.uniform(kw, (fan_in, fan_out), jnp.float32, -bound, bound)
        b = jax.random.uniform(kb, (1, fan_out), jnp.float32, -bound, bound)
        return w, b
    wq, bq = lin(keys[0], keys[1], q_size, num_hiddens)
    wk, bk = lin(keys[2], keys[3], k_size, num_hiddens)
    wv, bv = lin(keys[4], keys[5], v_size, num_hiddens)
    wo, bo = lin(keys[6], keys[7], num_hiddens, num_hiddens)
    return dict(wq=wq, bq=bq, wk=wk, bk=bk, wv=wv, bv=bv, wo=wo, bo=bo)


def _reference(x, p, heads):
    """Pure-JAX reference of the PyTorch forward (valid_lens=None, eval mode)."""
    B, N, _ = x.shape
    H = p["wq"].shape[1]
    d = H // heads
    q = x @ p["wq"] + p["bq"]
    k = x @ p["wk"] + p["bk"]
    v = x @ p["wv"] + p["bv"]
    def split(t):  # 'b n (h d) -> (b h) n d'
        return t.reshape(B, N, heads, d).transpose(0, 2, 1, 3).reshape(B * heads, N, d)
    q, k, v = split(q), split(k), split(v)
    scores = jnp.einsum("bnd,bmd->bnm", q, k) / math.sqrt(d)
    attn = jax.nn.softmax(scores, axis=-1)
    out = jnp.einsum("bnm,bmd->bnd", attn, v)
    out = out.reshape(B, heads, N, d).transpose(0, 2, 1, 3).reshape(B, N, H)
    return out @ p["wo"] + p["bo"]


if __name__ == "__main__":
    B, N = 2, 8
    q_size = k_size = v_size = 32
    heads, num_hiddens = 4, 32

    key = jax.random.PRNGKey(0)
    kx, kp = jax.random.split(key)
    x = jax.random.normal(kx, (B, N, q_size), jnp.float32)
    params = _init_params(kp, q_size, k_size, v_size, num_hiddens)

    prep = prepare_params(params, heads, dtype=x.dtype)   # one-time parameter prep
    out = multi_heads_atten_vit(x, prep, heads)
    out = jax.block_until_ready(out)

    ref = _reference(x, params, heads)
    assert out.shape == (B, N, num_hiddens)
    # Tolerance widened slightly vs. exact softmax because the kernel uses the hardware
    # approximate reciprocal (EUP) for the softmax denominator; inputs/weights stay f32
    # here so the bf16 fast path does not affect this test's accuracy.
    assert jnp.allclose(out, ref, atol=2e-3, rtol=2e-3), float(jnp.max(jnp.abs(out - ref)))
    print("KERNEL_OK")
</pallas_src>

<mosaic_0001>
module attributes {stable_mosaic.version = 11 : i64} {
  func.func @_mha_kernel(%arg0: i32, %arg1: memref<1x8x32xf32, #tpu.memory_space<vmem>>, %arg2: memref<32x96xf32, #tpu.memory_space<vmem>>, %arg3: memref<1x96xf32, #tpu.memory_space<vmem>>, %arg4: memref<32x128xf32, #tpu.memory_space<vmem>>, %arg5: memref<1x128xf32, #tpu.memory_space<vmem>>, %arg6: memref<1x8x128xf32, #tpu.memory_space<vmem>>) attributes {dimension_semantics = [#tpu.dimension_semantics<parallel>], iteration_bounds = array<i64: 2>, scalar_prefetch = 0 : i64, scratch_operands = 0 : i64, tpu.core_type = #tpu.core_type<tc>, window_params = [{transform_indices = @transform_0, window_bounds = array<i64: 1, 8, 32>}, {pipeline_mode = #tpu.pipeline_mode<synchronous>, transform_indices = @transform_1, window_bounds = array<i64: 32, 96>}, {pipeline_mode = #tpu.pipeline_mode<synchronous>, transform_indices = @transform_2, window_bounds = array<i64: 1, 96>}, {pipeline_mode = #tpu.pipeline_mode<synchronous>, transform_indices = @transform_3, window_bounds = array<i64: 32, 128>}, {pipeline_mode = #tpu.pipeline_mode<synchronous>, transform_indices = @transform_4, window_bounds = array<i64: 1, 128>}, {transform_indices = @transform_5, window_bounds = array<i64: 1, 8, 128>}]} {
    %c0 = arith.constant 0 : index
    %c0_0 = arith.constant 0 : index
    %c0_1 = arith.constant 0 : index
    %0 = vector.load %arg1[%c0, %c0_0, %c0_1] : memref<1x8x32xf32, #tpu.memory_space<vmem>>, vector<1x8x32xf32>
    %1 = vector.shape_cast %0 : vector<1x8x32xf32> to vector<8x32xf32>
    %c0_2 = arith.constant 0 : index
    %c0_3 = arith.constant 0 : index
    %2 = vector.load %arg2[%c0_2, %c0_3] : memref<32x96xf32, #tpu.memory_space<vmem>>, vector<32x96xf32>
    %cst = arith.constant dense<0.000000e+00> : vector<8x96xf32>
    %3 = tpu.matmul %1, %2, %cst {dimension_numbers = #tpu.dot_dimension_numbers<[1], [0], [0], [1], [0, 0, 1, 1], [], []>} : vector<8x32xf32>, vector<32x96xf32>, vector<8x96xf32> -> vector<8x96xf32>
    %c0_4 = arith.constant 0 : index
    %c0_5 = arith.constant 0 : index
    %4 = vector.load %arg3[%c0_4, %c0_5] : memref<1x96xf32, #tpu.memory_space<vmem>>, vector<1x96xf32>
    %5 = vector.shape_cast %4 : vector<1x96xf32> to vector<96xf32>
    %6 = vector.shape_cast %5 : vector<96xf32> to vector<1x96xf32>
    %7 = vector.broadcast %6 : vector<1x96xf32> to vector<8x96xf32>
    %8 = arith.addf %3, %7 : vector<8x96xf32>
    %9 = vector.extract_strided_slice %8 {offsets = [0, 0], sizes = [8, 32], strides = [1, 1]} : vector<8x96xf32> to vector<8x32xf32>
    %10 = vector.shape_cast %9 : vector<8x32xf32> to vector<1x8x4x8xf32>
    %11 = tpu.transpose %10, [0, 2, 1, 3] : vector<1x8x4x8xf32> -> vector<1x4x8x8xf32>
    %12 = vector.shape_cast %11 : vector<1x4x8x8xf32> to vector<4x8x8xf32>
    %13 = vector.extract_strided_slice %8 {offsets = [0, 32], sizes = [8, 32], strides = [1, 1]} : vector<8x96xf32> to vector<8x32xf32>
    %14 = vector.shape_cast %13 : vector<8x32xf32> to vector<1x8x4x8xf32>
    %15 = tpu.transpose %14, [0, 2, 1, 3] : vector<1x8x4x8xf32> -> vector<1x4x8x8xf32>
    %16 = vector.shape_cast %15 : vector<1x4x8x8xf32> to vector<4x8x8xf32>
    %17 = vector.extract_strided_slice %8 {offsets = [0, 64], sizes = [8, 32], strides = [1, 1]} : vector<8x96xf32> to vector<8x32xf32>
    %18 = vector.shape_cast %17 : vector<8x32xf32> to vector<1x8x4x8xf32>
    %19 = tpu.transpose %18, [0, 2, 1, 3] : vector<1x8x4x8xf32> -> vector<1x4x8x8xf32>
    %20 = vector.shape_cast %19 : vector<1x4x8x8xf32> to vector<4x8x8xf32>
    "tpu.trace_start"() <{level = 10 : i32, message = "bnd,bmd->bnm"}> : () -> ()
    %cst_6 = arith.constant dense<0.000000e+00> : vector<4x8x8xf32>
    %21 = tpu.matmul %12, %16, %cst_6 {dimension_numbers = #tpu.dot_dimension_numbers<[2], [2], [1], [1], [0, 0, 0, 1, 1, 1], [0], [0]>} : vector<4x8x8xf32>, vector<4x8x8xf32>, vector<4x8x8xf32> -> vector<4x8x8xf32>
    "tpu.trace_stop"() : () -> ()
    %cst_7 = arith.constant dense<0xFF800000> : vector<4x8xf32>
    %22 = vector.multi_reduction <maximumf>, %21, %cst_7 [2] : vector<4x8x8xf32> to vector<4x8xf32>
    %23 = vector.shape_cast %22 : vector<4x8xf32> to vector<4x8x1xf32>
    %24 = vector.broadcast %23 : vector<4x8x1xf32> to vector<4x8x8xf32>
    %25 = arith.subf %21, %24 : vector<4x8x8xf32>
    %26 = math.exp %25 : vector<4x8x8xf32>
    %cst_8 = arith.constant dense<0.000000e+00> : vector<4x8xf32>
    %27 = vector.multi_reduction <add>, %26, %cst_8 [2] : vector<4x8x8xf32> to vector<4x8xf32>
    %28 = vector.shape_cast %27 : vector<4x8xf32> to vector<4x8x1xf32>
    "tpu.trace_start"() <{level = 10 : i32, message = "bnm,bmd->bnd"}> : () -> ()
    %cst_9 = arith.constant dense<0.000000e+00> : vector<4x8x8xf32>
    %29 = tpu.matmul %26, %20, %cst_9 {dimension_numbers = #tpu.dot_dimension_numbers<[2], [1], [1], [2], [0, 0, 0, 1, 1, 2], [0], [0]>} : vector<4x8x8xf32>, vector<4x8x8xf32>, vector<4x8x8xf32> -> vector<4x8x8xf32>
    "tpu.trace_stop"() : () -> ()
    %30 = tpu.reciprocal %28 {approx = true} : vector<4x8x1xf32> -> vector<4x8x1xf32>
    %31 = vector.broadcast %30 : vector<4x8x1xf32> to vector<4x8x8xf32>
    %32 = arith.mulf %29, %31 : vector<4x8x8xf32>
    %33 = vector.shape_cast %32 : vector<4x8x8xf32> to vector<1x4x8x8xf32>
    %34 = tpu.transpose %33, [0, 2, 1, 3] : vector<1x4x8x8xf32> -> vector<1x8x4x8xf32>
    %35 = vector.shape_cast %34 : vector<1x8x4x8xf32> to vector<8x32xf32>
    %c0_10 = arith.constant 0 : index
    %c0_11 = arith.constant 0 : index
    %36 = vector.load %arg4[%c0_10, %c0_11] : memref<32x128xf32, #tpu.memory_space<vmem>>, vector<32x128xf32>
    %cst_12 = arith.constant dense<0.000000e+00> : vector<8x128xf32>
    %37 = tpu.matmul %35, %36, %cst_12 {dimension_numbers = #tpu.dot_dimension_numbers<[1], [0], [0], [1], [0, 0, 1, 1], [], []>} : vector<8x32xf32>, vector<32x128xf32>, vector<8x128xf32> -> vector<8x128xf32>
    %c0_13 = arith.constant 0 : index
    %c0_14 = arith.constant 0 : index
    %38 = vector.load %arg5[%c0_13, %c0_14] : memref<1x128xf32, #tpu.memory_space<vmem>>, vector<1x128xf32>
    %39 = vector.shape_cast %38 : vector<1x128xf32> to vector<128xf32>
    %40 = vector.shape_cast %39 : vector<128xf32> to vector<1x128xf32>
    %41 = vector.broadcast %40 : vector<1x128xf32> to vector<8x128xf32>
    %42 = arith.addf %37, %41 : vector<8x128xf32>
    %43 = vector.shape_cast %42 : vector<8x128xf32> to vector<1x8x128xf32>
    %c0_15 = arith.constant 0 : index
    %c0_16 = arith.constant 0 : index
    %c0_17 = arith.constant 0 : index
    %44 = vector.load %arg6[%c0_15, %c0_16, %c0_17] : memref<1x8x128xf32, #tpu.memory_space<vmem>>, vector<1x8x128xf32>
    tpu.vector_store %arg6[%c0_15, %c0_16, %c0_17], %43 {strides = array<i32>} : memref<1x8x128xf32, #tpu.memory_space<vmem>>, vector<1x8x128xf32>,
    return
  }
  func.func @transform_0(%arg0: i32) -> (i32, i32, i32) {
    %c0_i32 = arith.constant 0 : i32
    %c0_i32_0 = arith.constant 0 : i32
    %c0_i32_1 = arith.constant 0 : i32
    return %arg0, %c0_i32, %c0_i32_0 : i32, i32, i32
  }
  func.func @transform_1(%arg0: i32) -> (i32, i32) {
    %c0_i32 = arith.constant 0 : i32
    %c0_i32_0 = arith.constant 0 : i32
    %c0_i32_1 = arith.constant 0 : i32
    return %c0_i32, %c0_i32_0 : i32, i32
  }
  func.func @transform_2(%arg0: i32) -> (i32, i32) {
    %c0_i32 = arith.constant 0 : i32
    %c0_i32_0 = arith.constant 0 : i32
    %c0_i32_1 = arith.constant 0 : i32
    return %c0_i32, %c0_i32_0 : i32, i32
  }
  func.func @transform_3(%arg0: i32) -> (i32, i32) {
    %c0_i32 = arith.constant 0 : i32
    %c0_i32_0 = arith.constant 0 : i32
    %c0_i32_1 = arith.constant 0 : i32
    return %c0_i32, %c0_i32_0 : i32, i32
  }
  func.func @transform_4(%arg0: i32) -> (i32, i32) {
    %c0_i32 = arith.constant 0 : i32
    %c0_i32_0 = arith.constant 0 : i32
    %c0_i32_1 = arith.constant 0 : i32
    return %c0_i32, %c0_i32_0 : i32, i32
  }
  func.func @transform_5(%arg0: i32) -> (i32, i32, i32) {
    %c0_i32 = arith.constant 0 : i32
    %c0_i32_0 = arith.constant 0 : i32
    %c0_i32_1 = arith.constant 0 : i32
    return %arg0, %c0_i32, %c0_i32_0 : i32, i32, i32
  }
}

module attributes {stable_mosaic.version = 11 : i64} {
  func.func @_mha_kernel(%arg0: i32, %arg1: memref<1x8x32xf32, #tpu.memory_space<vmem>>, %arg2: memref<32x96xf32, #tpu.memory_space<vmem>>, %arg3: memref<1x96xf32, #tpu.memory_space<vmem>>, %arg4: memref<32x128xf32, #tpu.memory_space<vmem>>, %arg5: memref<1x128xf32, #tpu.memory_space<vmem>>, %arg6: memref<1x8x128xf32, #tpu.memory_space<vmem>>) attributes {dimension_semantics = [#tpu.dimension_semantics<parallel>], iteration_bounds = array<i64: 2>, scalar_prefetch = 0 : i64, scratch_operands = 0 : i64, tpu.core_type = #tpu.core_type<tc>, window_params = [{transform_indices = @transform_0, window_bounds = array<i64: 1, 8, 32>}, {pipeline_mode = #tpu.pipeline_mode<synchronous>, transform_indices = @transform_1, window_bounds = array<i64: 32, 96>}, {pipeline_mode = #tpu.pipeline_mode<synchronous>, transform_indices = @transform_2, window_bounds = array<i64: 1, 96>}, {pipeline_mode = #tpu.pipeline_mode<synchronous>, transform_indices = @transform_3, window_bounds = array<i64: 32, 128>}, {pipeline_mode = #tpu.pipeline_mode<synchronous>, transform_indices = @transform_4, window_bounds = array<i64: 1, 128>}, {transform_indices = @transform_5, window_bounds = array<i64: 1, 8, 128>}]} {
    %c0 = arith.constant 0 : index
    %c0_0 = arith.constant 0 : index
    %c0_1 = arith.constant 0 : index
    %0 = vector.load %arg1[%c0, %c0_0, %c0_1] : memref<1x8x32xf32, #tpu.memory_space<vmem>>, vector<1x8x32xf32>
    %1 = vector.shape_cast %0 : vector<1x8x32xf32> to vector<8x32xf32>
    %c0_2 = arith.constant 0 : index
    %c0_3 = arith.constant 0 : index
    %2 = vector.load %arg2[%c0_2, %c0_3] : memref<32x96xf32, #tpu.memory_space<vmem>>, vector<32x96xf32>
    %cst = arith.constant dense<0.000000e+00> : vector<8x96xf32>
    %3 = tpu.matmul %1, %2, %cst {dimension_numbers = #tpu.dot_dimension_numbers<[1], [0], [0], [1], [0, 0, 1, 1], [], []>} : vector<8x32xf32>, vector<32x96xf32>, vector<8x96xf32> -> vector<8x96xf32>
    %c0_4 = arith.constant 0 : index
    %c0_5 = arith.constant 0 : index
    %4 = vector.load %arg3[%c0_4, %c0_5] : memref<1x96xf32, #tpu.memory_space<vmem>>, vector<1x96xf32>
    %5 = vector.shape_cast %4 : vector<1x96xf32> to vector<96xf32>
    %6 = vector.shape_cast %5 : vector<96xf32> to vector<1x96xf32>
    %7 = vector.broadcast %6 : vector<1x96xf32> to vector<8x96xf32>
    %8 = arith.addf %3, %7 : vector<8x96xf32>
    %9 = vector.extract_strided_slice %8 {offsets = [0, 0], sizes = [8, 32], strides = [1, 1]} : vector<8x96xf32> to vector<8x32xf32>
    %10 = vector.shape_cast %9 : vector<8x32xf32> to vector<1x8x4x8xf32>
    %11 = tpu.transpose %10, [0, 2, 1, 3] : vector<1x8x4x8xf32> -> vector<1x4x8x8xf32>
    %12 = vector.shape_cast %11 : vector<1x4x8x8xf32> to vector<4x8x8xf32>
    %13 = vector.extract_strided_slice %8 {offsets = [0, 32], sizes = [8, 32], strides = [1, 1]} : vector<8x96xf32> to vector<8x32xf32>
    %14 = vector.shape_cast %13 : vector<8x32xf32> to vector<1x8x4x8xf32>
    %15 = tpu.transpose %14, [0, 2, 1, 3] : vector<1x8x4x8xf32> -> vector<1x4x8x8xf32>
    %16 = vector.shape_cast %15 : vector<1x4x8x8xf32> to vector<4x8x8xf32>
    %17 = vector.extract_strided_slice %8 {offsets = [0, 64], sizes = [8, 32], strides = [1, 1]} : vector<8x96xf32> to vector<8x32xf32>
    %18 = vector.shape_cast %17 : vector<8x32xf32> to vector<1x8x4x8xf32>
    %19 = tpu.transpose %18, [0, 2, 1, 3] : vector<1x8x4x8xf32> -> vector<1x4x8x8xf32>
    %20 = vector.shape_cast %19 : vector<1x4x8x8xf32> to vector<4x8x8xf32>
    "tpu.trace_start"() <{level = 10 : i32, message = "bnd,bmd->bnm"}> : () -> ()
    %cst_6 = arith.constant dense<0.000000e+00> : vector<4x8x8xf32>
    %21 = tpu.matmul %12, %16, %cst_6 {dimension_numbers = #tpu.dot_dimension_numbers<[2], [2], [1], [1], [0, 0, 0, 1, 1, 1], [0], [0]>} : vector<4x8x8xf32>, vector<4x8x8xf32>, vector<4x8x8xf32> -> vector<4x8x8xf32>
    "tpu.trace_stop"() : () -> ()
    %cst_7 = arith.constant dense<0xFF800000> : vector<4x8xf32>
    %22 = vector.multi_reduction <maximumf>, %21, %cst_7 [2] : vector<4x8x8xf32> to vector<4x8xf32>
    %23 = vector.shape_cast %22 : vector<4x8xf32> to vector<4x8x1xf32>
    %24 = vector.broadcast %23 : vector<4x8x1xf32> to vector<4x8x8xf32>
    %25 = arith.subf %21, %24 : vector<4x8x8xf32>
    %26 = math.exp %25 : vector<4x8x8xf32>
    %cst_8 = arith.constant dense<0.000000e+00> : vector<4x8xf32>
    %27 = vector.multi_reduction <add>, %26, %cst_8 [2] : vector<4x8x8xf32> to vector<4x8xf32>
    %28 = vector.shape_cast %27 : vector<4x8xf32> to vector<4x8x1xf32>
    "tpu.trace_start"() <{level = 10 : i32, message = "bnm,bmd->bnd"}> : () -> ()
    %cst_9 = arith.constant dense<0.000000e+00> : vector<4x8x8xf32>
    %29 = tpu.matmul %26, %20, %cst_9 {dimension_numbers = #tpu.dot_dimension_numbers<[2], [1], [1], [2], [0, 0, 0, 1, 1, 2], [0], [0]>} : vector<4x8x8xf32>, vector<4x8x8xf32>, vector<4x8x8xf32> -> vector<4x8x8xf32>
    "tpu.trace_stop"() : () -> ()
    %30 = tpu.reciprocal %28 {approx = true} : vector<4x8x1xf32> -> vector<4x8x1xf32>
    %31 = vector.broadcast %30 : vector<4x8x1xf32> to vector<4x8x8xf32>
    %32 = arith.mulf %29, %31 : vector<4x8x8xf32>
    %33 = vector.shape_cast %32 : vector<4x8x8xf32> to vector<1x4x8x8xf32>
    %34 = tpu.transpose %33, [0, 2, 1, 3] : vector<1x4x8x8xf32> -> vector<1x8x4x8xf32>
    %35 = vector.shape_cast %34 : vector<1x8x4x8xf32> to vector<8x32xf32>
    %c0_10 = arith.constant 0 : index
    %c0_11 = arith.constant 0 : index
    %36 = vector.load %arg4[%c0_10, %c0_11] : memref<32x128xf32, #tpu.memory_space<vmem>>, vector<32x128xf32>
    %cst_12 = arith.constant dense<0.000000e+00> : vector<8x128xf32>
    %37 = tpu.matmul %35, %36, %cst_12 {dimension_numbers = #tpu.dot_dimension_numbers<[1], [0], [0], [1], [0, 0, 1, 1], [], []>} : vector<8x32xf32>, vector<32x128xf32>, vector<8x128xf32> -> vector<8x128xf32>
    %c0_13 = arith.constant 0 : index
    %c0_14 = arith.constant 0 : index
    %38 = vector.load %arg5[%c0_13, %c0_14] : memref<1x128xf32, #tpu.memory_space<vmem>>, vector<1x128xf32>
    %39 = vector.shape_cast %38 : vector<1x128xf32> to vector<128xf32>
    %40 = vector.shape_cast %39 : vector<128xf32> to vector<1x128xf32>
    %41 = vector.broadcast %40 : vector<1x128xf32> to vector<8x128xf32>
    %42 = arith.addf %37, %41 : vector<8x128xf32>
    %43 = vector.shape_cast %42 : vector<8x128xf32> to vector<1x8x128xf32>
    %c0_15 = arith.constant 0 : index
    %c0_16 = arith.constant 0 : index
    %c0_17 = arith.constant 0 : index
    %44 = vector.load %arg6[%c0_15, %c0_16, %c0_17] : memref<1x8x128xf32, #tpu.memory_space<vmem>>, vector<1x8x128xf32>
    tpu.vector_store %arg6[%c0_15, %c0_16, %c0_17], %43 {strides = array<i32>} : memref<1x8x128xf32, #tpu.memory_space<vmem>>, vector<1x8x128xf32>,
    return
  }
  func.func @transform_0(%arg0: i32) -> (i32, i32, i32) {
    %c0_i32 = arith.constant 0 : i32
    %c0_i32_0 = arith.constant 0 : i32
    %c0_i32_1 = arith.constant 0 : i32
    return %arg0, %c0_i32, %c0_i32_0 : i32, i32, i32
  }
  func.func @transform_1(%arg0: i32) -> (i32, i32) {
    %c0_i32 = arith.constant 0 : i32
    %c0_i32_0 = arith.constant 0 : i32
    %c0_i32_1 = arith.constant 0 : i32
    return %c0_i32, %c0_i32_0 : i32, i32
  }
  func.func @transform_2(%arg0: i32) -> (i32, i32) {
    %c0_i32 = arith.constant 0 : i32
    %c0_i32_0 = arith.constant 0 : i32
    %c0_i32_1 = arith.constant 0 : i32
    return %c0_i32, %c0_i32_0 : i32, i32
  }
  func.func @transform_3(%arg0: i32) -> (i32, i32) {
    %c0_i32 = arith.constant 0 : i32
    %c0_i32_0 = arith.constant 0 : i32
    %c0_i32_1 = arith.constant 0 : i32
    return %c0_i32, %c0_i32_0 : i32, i32
  }
  func.func @transform_4(%arg0: i32) -> (i32, i32) {
    %c0_i32 = arith.constant 0 : i32
    %c0_i32_0 = arith.constant 0 : i32
    %c0_i32_1 = arith.constant 0 : i32
    return %c0_i32, %c0_i32_0 : i32, i32
  }
  func.func @transform_5(%arg0: i32) -> (i32, i32, i32) {
    %c0_i32 = arith.constant 0 : i32
    %c0_i32_0 = arith.constant 0 : i32
    %c0_i32_1 = arith.constant 0 : i32
    return %arg0, %c0_i32, %c0_i32_0 : i32, i32, i32
  }
}

</mosaic_0001>

<bundles_post_ra>
// kernel: tpu_custom_call.1
= control target key start
LH: loop header
LB: loop body
LE: loop exit
PB: predicated region body
PF: predicated region fallthrough
CT: control target
= control target key end

     0   :  { %10 = vsyncpa [#allocation3], 0  ;;  %s2602_s0 = inlined_call_operand.hbm [shape: f32[2,8,32], index: 0, kind: input, shape index: {}]   ;;  %s2603_s1 = inlined_call_operand.hbm [shape: f32[32,96], index: 1, kind: input, shape index: {}]   ;;  %s2604_s2 = inlined_call_operand.vmem [shape: f32[1,96], index: 2, kind: input, shape index: {}]   ;;  %s2605_s3 = inlined_call_operand.hbm [shape: f32[32,128], index: 3, kind: input, shape index: {}]   ;;  %s2606_s4 = inlined_call_operand.vmem [shape: f32[1,128], index: 4, kind: input, shape index: {}]   ;;  %s2607_s5 = inlined_call_operand.hbm [shape: f32[2,8,128], index: 5, kind: output, shape index: {}]  }
   0x1   :  { %12 = vsyncpa [#allocation3 + $0x1], 0 }
   0x2   :  { %13 = vsyncpa [#allocation6], 0 }
   0x3   :  { %14 = vsyncpa [#allocation4], 0 }
   0x4   :  { %16 = vsyncpa [#allocation4 + $0x1], 0  ;;  %s2224_s18 = smov 0   ;;  %s2226_s19 = smov 0  }
   0x5   :  { %s2228_s20 = smov 0   ;;  %s2230_s21 = smov 0  }
   0x6 LB: > { %s2245_s22 = sadd.s32 4294967295, %s2173_s21   ;;  %s1779_s23 = sadd.s32 4294967294, %s2173_s21   ;;  %s2173_s21 = sphi %s2230_s21, %s2627_s21   ;;  %s2169_s20 = sphi %s2228_s20, %s2626_s20   ;;  %s2165_s19 = sphi %s2226_s19, %s2625_s19   ;;  %s2161_s18 = sphi %s2224_s18, %s2624_s18  }
   0x7   : > { %p42_p0 = scmp.ne.s32.totalorder %s2165_s19, %s2161_s18  ;;  %p2608_p1 = scmp.eq.s32.totalorder %s2245_s22, 0 }
   0x8   : > { %p156_p3 = scmp.eq.s32.totalorder %s1779_s23, 1  ;;  %p1780_p5 = scmp.ge.s32.totalorder %s2173_s21, 1 }
   0x9   : > { %p2254_p4 = por %p2608_p1, %p42_p0  ;;  %p163_p7 = scmp.lt.s32.totalorder %s2173_s21, 3 }
   0xa   : > { %p2259_p6 = por %p156_p3, %p42_p0  ;;  %s2175_s27 = smov [#allocation5]  }
   0xb   : > { %s2611_s24 = scalar_select %p2254_p4, 1, 0 }
   0xc   : > { %s2612_s25 = scalar_select %p2259_p6, 1, 0 }
   0xd   : > { %p2264_p8 = pnand %p1780_p5, %p163_p7  ;;  %s175_s28 = sshll.u32 %s2175_s27, 4  ;;  %s2268_s28 = int_to_ptr.vmem [resolvable:$true] %s175_s28 }
   0xe   : > { %s2176_s30 = smov [#allocation7]   ;;  %s2017_s9 = scalar_lea.hbm %s2603_s1, 512 }
   0xf   : > { %p1931_p9 = pneg %p2264_p8  ;;  %s191_s6 = sshll.u32 %s2176_s30, 4  ;;  %s2279_s6 = int_to_ptr.vmem [resolvable:$true] %s191_s6 }
  0x10   : > { %p2018_p12 = scmp.ne.s32.totalorder %s2603_s1, %s2017_s9  ;;  %p2024_p5 = scmp.lt.u32.totalorder %s2017_s9, %s2603_s1 }
  0x11   : > { %p2275_p11 = pnand %p1931_p9, %p2608_p1 }
  0x13   : > { %p2019_p13 = pneg %p2275_p11 }
  0x15   : > { %p2020_p0 = pnand %p2019_p13, %p2018_p12 }
  0x17   : > { %p2021_p3 = pneg %p2020_p0 }
  0x19   : > { %p2026_p7 = pnand %p2024_p5, %p2021_p3 }
  0x1b   : > { %2029 = shalt.err (!%p2026_p7)
}
  0x1c   : > { %s2030_s14 = scalar_lea.vmem %s2268_s28, 512  ;;  %p2038_p2 = scmp.lt.s32.totalorder %s2268_s28, %s2268_s28 }
  0x1d   : > { %p2031_p9 = scmp.ne.s32.totalorder %s2268_s28, %s2030_s14  ;;  %p2039_p12 = scmp.lt.s32.totalorder %s2030_s14, %s2030_s14 }
  0x1f   : > { %p2033_p10 = pnand %p2031_p9, %p2019_p13  ;;  %p2040_p0 = por %p2039_p12, %p2038_p2 }
  0x21   : > { %p2034_p1 = pneg %p2033_p10 }
  0x23   : > { %p2041_p6 = pnand %p2040_p0, %p2034_p1 }
  0x25   : > { %2044 = shalt.err (!%p2041_p6)
}
  0x26   : > { %s2177_s15 = smov 128   ;;  %s2178_s16 = smov 8  }
  0x27   : > { %1934 = dma.hbm_to_vmem [thread:$0]  (!%p2275_p11), %s2603_s1, 512, %s2268_s28, [#allocation6], %s2177_s15, %s2177_s15, %s2178_s16  }
  0x28   : > { %s2045_s7 = scalar_lea.hbm %s2605_s3, 512 }
  0x29   : > { %p2046_p2 = scmp.ne.s32.totalorder %s2605_s3, %s2045_s7  ;;  %p2052_p10 = scmp.lt.u32.totalorder %s2045_s7, %s2605_s3 }
  0x2b   : > { %p2048_p1 = pnand %p2046_p2, %p2019_p13 }
  0x2d   : > { %p2049_p6 = pneg %p2048_p1 }
  0x2f   : > { %p2054_p3 = pnand %p2052_p10, %p2049_p6 }
  0x31   : > { %2057 = shalt.err (!%p2054_p3)
}
  0x32   : > { %s2058_s28 = scalar_lea.vmem %s2279_s6, 512  ;;  %p2066_p12 = scmp.lt.s32.totalorder %s2279_s6, %s2279_s6 }
  0x33   : > { %p2059_p5 = scmp.ne.s32.totalorder %s2279_s6, %s2058_s28  ;;  %p2067_p0 = scmp.lt.s32.totalorder %s2058_s28, %s2058_s28 }
  0x35   : > { %p2061_p7 = pnand %p2059_p5, %p2019_p13  ;;  %p2068_p2 = por %p2067_p0, %p2066_p12 }
  0x37   : > { %p2062_p9 = pneg %p2061_p7 }
  0x39   : > { %p2069_p1 = pnand %p2068_p2, %p2062_p9 }
  0x3b   : > { %2072 = shalt.err (!%p2069_p1)
}
  0x3c   : > { %1937 = dma.hbm_to_vmem [thread:$0]  (!%p2275_p11), %s2605_s3, 512, %s2279_s6, [#allocation6], %s2177_s15, %s2177_s15, %s2178_s16  }
  0x3d   : > { %s2334_s14 = sadd.s32 1, %s2173_s21   ;;  %s29_s29 = sadd.s32 1, %s2169_s20 }
  0x3e   : > { %s26_s17 = ssub.s32 %s2173_s21, %s2334_s14  ;;  %p36_p13 = scmp.ne.s32.totalorder %s2169_s20, %s2165_s19 }
  0x3f   : > { %p27_p6 = scmp.eq.s32.totalorder %s26_s17, 0  ;;  %p37_p10 = scmp.eq.s32.totalorder %s2173_s21, 0 }
  0x40   : > { %p2615_p3 = scmp.eq.s32.totalorder %s2245_s22, 1  ;;  %p1948_p7 = scmp.lt.s32.totalorder %s2173_s21, 2 }
  0x41   : > { %s2350_s27 = scalar_select %p27_p6, %s2169_s20, %s29_s29  }
  0x42   : > { %p2344_p5 = por %p2615_p3, %p36_p13  ;;  %p38_p9 = por %p37_p10, %p36_p13 }
  0x43   : > { %s208_s30 = sand.u32 1, %s2169_s20   ;;  %s1785_s6 = sshll.u32 %s2173_s21, 7 }
  0x44   : > { %s2616_s23 = scalar_select %p2344_p5, 1, 0 }
  0x45   : > { %s1784_s7 = sshll.u32 %s208_s30, 3  ;;  %s2357_s8 = scalar_lea.hbm %s2602_s0, %s1785_s6 }
  0x46   : > { %s212_s9 = scalar_lea.vmem [#allocation2], %s1784_s7  ;;  %p2361_p11 = pnand %p1948_p7, %p38_p9 }
  0x47   : > { %s219_s10 = sshll.u32 %s212_s9, 4  ;;  %s209_s28 = scalar_lea.sflag [#allocation3], %s208_s30  ;;  %s2359_s10 = int_to_ptr.vmem [resolvable:$true] %s219_s10 }
  0x48   : > { %s2073_s12 = scalar_lea.hbm %s2357_s8, 128  ;;  %p2075_p0 = pneg %p2361_p11 }
  0x49   : > { %p2074_p12 = scmp.ne.s32.totalorder %s2357_s8, %s2073_s12  ;;  %s2078_s17 = scalar_lea.hbm %s2602_s0, 256 }
  0x4a   : > { %p2079_p13 = scmp.lt.u32.totalorder %s2357_s8, %s2602_s0  ;;  %p2080_p6 = scmp.lt.u32.totalorder %s2078_s17, %s2073_s12 }
  0x4b   : > { %p2076_p2 = pnand %p2075_p0, %p2074_p12  ;;  %p2082_p3 = scmp.lt.u32.totalorder %s2073_s12, %s2357_s8 }
  0x4c   : > { %p2081_p10 = por %p2080_p6, %p2079_p13 }
  0x4d   : > { %p2077_p1 = pneg %p2076_p2 }
  0x4e   : > { %p2083_p7 = por %p2082_p3, %p2081_p10 }
  0x50   : > { %p2084_p9 = pnand %p2083_p7, %p2077_p1 }
  0x52   : > { %2087 = shalt.err (!%p2084_p9)
}
  0x53   : > { %s2088_s30 = scalar_lea.vmem %s2359_s10, 128  ;;  %s2179_s15 = smov [#allocation2]  }
  0x54   : > { %p2089_p12 = scmp.ne.s32.totalorder %s2359_s10, %s2088_s30  ;;  %s2093_s16 = sshll.u32 %s2179_s15, 4  ;;  %s2094_s16 = int_to_ptr.vmem [resolvable:$false] %s2093_s16 }
  0x55   : > { %s2095_s9 = scalar_lea.vmem %s2094_s16, 256  ;;  %p2096_p4 = scmp.lt.s32.totalorder %s2359_s10, %s2094_s16 }
  0x56   : > { %p2091_p2 = pnand %p2089_p12, %p2075_p0  ;;  %p2097_p13 = scmp.lt.s32.totalorder %s2095_s9, %s2088_s30 }
  0x58   : > { %p2092_p5 = pneg %p2091_p2  ;;  %p2098_p6 = por %p2097_p13, %p2096_p4 }
  0x5a   : > { %p2099_p10 = pnand %p2098_p6, %p2092_p5 }
  0x5c   : > { %2102 = shalt.err (!%p2099_p10)
}
  0x5d   : > { %1941 = dma.hbm_to_vmem [thread:$0]  (!%p2361_p11), %s2357_s8, 128, %s2359_s10, %s209_s28  }
  0x5e   : > { %228 = sbr.rel (%p2264_p8) target bundleno = 1558 (0x616), region = 40  ;;  %s2393_s12 = sand.u32 (!%p2264_p8), 1, %s2165_s19  }
  0x5f   : > { %s1787_s13 = sshll.u32 (!%p2264_p8), %s2393_s12, 3  ;;  %s231_s29 = scalar_lea.sflag (!%p2264_p8), [#allocation3], %s2393_s12 }
  0x60   : > { %s234_s17 = scalar_lea.vmem (!%p2264_p8), [#allocation2], %s1787_s13  ;;  %p2618_p4 = scmp.ne.s32.totalorder (!%p2264_p8), %s2611_s24, 0 }
  0x65   : > { %2148 = dma.done.wait (%p2618_p4), %s231_s29, 128  }
  0x66   : > { %2150 = vsyncadd (%p2618_p4), %s231_s29, 4294967168  ;;  %p2619_p5 = scmp.eq.s32.totalorder %s2245_s22, 0 }
  0x68   : > { %2152 = dma.done.wait (%p2619_p5), [#allocation6], 1024   ;;  %p2620_p8 = pmov %p2619_p5 }
  0x69   : > { %v2180_v0 = vmov 0.0|0.0   ;;  %vm2181_vm0 = vmmov 0   ;;  %v2182_v1 = vmov 0.0   ;;  %v270_v2 = vld [vmem:[#allocation5] sm:$0xff]  ;;  %v271_v3 = vld [vmem:[#allocation5 + $0x8] sm:$0xff]  ;;  %v272_v4 = vld [vmem:[#allocation5 + $0x10] sm:$0xff]  ;;  %v370_v18 = vlaneseq }
  0x6a   : > { %2154 = vsyncadd (%p2620_p8), [#allocation6], 4294966272  ;;  %1907 = vmatprep.subr.bf16.mxu0 %v2180_v0  ;;  %1853 = vmatprep.mubr.msk.f32.mxu0 %vm2181_vm0, %v2182_v1  ;;  %v1908_v5 = vpack.c.bf16 %v271_v3, %v270_v2  ;;  %v273_v6 = vld [vmem:[#allocation5 + $0x18] sm:$0xff]  ;;  %vm281_vm1 = vcmask 261120   ;;  %v1791_v9 = vld [vmem:[%s2604_s2] ss:$0 sm:$0xff] }
  0x6b   : > { %1856 = vmatprep.subr.mxu1 %v2182_v1  ;;  %1858 = vmatprep.mubr.msk.f32.mxu1 %vm2181_vm0, %v2182_v1  ;;  %v1911_v7 = vpack.c.bf16 %v273_v6, %v272_v4  ;;  %v269_v8 = vld [vmem:[%s234_s17] sm:$0xff]  ;;  %s2183_s8 = smov 104   ;;  %s2184_s10 = smov 120   ;;  %v2188_v16 = vmov 1983009808   ;;  %v371_v20 = vshrl.u32 %v370_v18, 7 }
  0x6c   : > { %1909 = vmatpush3.bf16.msra.mxu0 %v1908_v5  ;;  %s2185_s11 = smov 96   ;;  %s2186_s28 = smov 112   ;;  %v368_v17 = vunpack.c.l.s4 %v2188_v16  ;;  %v2189_v21 = vmov 1934713408   ;;  %vm797_vm2 = vcmask 64512   ;;  %vm1587_vm3 = vcmask 130048  }
  0x6d   : > { %1910 = vmatprep.subr.bf16.mxu0 %v2180_v0  ;;  %s2187_s7 = smov 64   ;;  %v400_v22 = vunpack.c.l.s4 %v2189_v21  ;;  %s2190_s6 = smov 16   ;;  %vm1589_vm4 = vcmask 195584  }
  0x6e   : > { %v369_v19 = vunpack.c.0.s8 %v368_v17  ;;  %s2191_s30 = smov 8   ;;  %s2192_s15 = smov 24  }
  0x6f   : > { %v401_v28 = vunpack.c.0.s8 %v400_v22  ;;  %s1816_s29 = sshll.u32 %s2245_s22, 7  ;;  %s268_s17 = scalar_lea.vmem [#allocation8], %s1787_s13 }
  0x70   : > { %1912 = vmatpush3.bf16.msra.mxu0 %v1911_v7  ;;  %v2431_v25 = vsub.s32 %v369_v19, %v371_v20  ;;  %s1690_s24 = sshll.u32 %s268_s17, 4  ;;  %p2621_p0 = scmp.ne.s32.totalorder %s2616_s23, 0  ;;  %s2560_s24 = int_to_ptr.vmem [resolvable:$true] %s1690_s24 }
  0x71   : > { %1876 = vmatprep.subr.mxu0 %v2182_v1  ;;  %v2439_v33 = vsub.s32 %v401_v28, %v371_v20  ;;  %s2193_s22 = smov [#allocation8]  }
  0x72   : > { %s2107_s13 = sshll.u32 %s2193_s22, 4  ;;  %s2108_s13 = int_to_ptr.vmem [resolvable:$false] %s2107_s13 }
  0x73   : > { %1854 = vmatmul.mubr.msk.f32.vlgmr.msra.gmra.mrb[0].mxu0 %vm281_vm1, %v269_v8  ;;  %p2110_p7 = scmp.lt.s32.totalorder %s2560_s24, %s2108_s13 }
  0x74   : > { %1878 = vmatprep.mubr.msk.f32.mxu0 %vm2181_vm0, %v2182_v1 }
 0x146   : > { %v351_v10 = vpop.f32.mrb[0].mxu0 }
 0x147   : > { %v352_v11 = vadd.f32 %v1791_v9, %v351_v10  ;;  %v1855_v12 = vpop.f32.mrb[1].mxu0 }
 0x149   : > { %362 = vrot.lane.b32.xlu1 %v352_v11, %s2183_s8  ;;  %356 = vrot.lane.b32.xlu0 %v352_v11, %s2184_s10  ;;  %s2558_s10 = scalar_lea.hbm %s2607_s5, %s1816_s29 }
 0x14d   : > { %501 = vrot.lane.b32.xlu1 %v352_v11, %s2185_s11  ;;  %359 = vrot.lane.b32.xlu0 %v352_v11, %s2186_s28  ;;  %s2103_s28 = scalar_lea.vmem %s2560_s24, 128 }
 0x14e   : > { %p2104_p11 = scmp.ne.s32.totalorder %s2560_s24, %s2103_s28 }
 0x150   : > { %p2105_p1 = pnand %p2104_p11, %p2621_p0 }
 0x152   : > { %p2106_p3 = pneg %p2105_p1 }
 0x1bb   : > { %v357_v13 = vpop.permute.xlu0 %356  ;;  %v2421_v14 = vpop.permute.xlu1 %362 }
 0x1bc   : > { %503 = vrot.lane.b32.xlu0 %v357_v13, %s2185_s11  ;;  %v381_v26 = vcombine.low %v357_v13, %v2421_v14  ;;  %v382_v27 = vcombine.high %v357_v13, %v2421_v14 }
 0x1be   : > { %v389_v31 = vrot.slane %v381_v26, %v2431_v25  ;;  %v396_v32 = vrot.slane %v382_v27, %v2431_v25 }
 0x1bf   : > { %v2423_v15 = vpop.permute.xlu0 %359  ;;  %v502_v34 = vpop.permute.xlu1 %501 }
 0x1c0   : > { %507 = vrot.lane.b32.xlu0 %v2421_v14, %s2185_s11  ;;  %505 = vrot.lane.b32.xlu1 %v2423_v15, %s2185_s11  ;;  %v365_v23 = vcombine.low %v352_v11, %v2423_v15  ;;  %v366_v24 = vcombine.high %v352_v11, %v2423_v15  ;;  %s1677_s11 = scalar_lea.sflag [#allocation4], %s2393_s12 }
 0x1c2   : > { %v373_v29 = vrot.slane %v365_v23, %v2431_v25  ;;  %v380_v30 = vrot.slane %v366_v24, %v2431_v25 }
 0x1c4   : > { %649 = vrot.lane.b32.xlu0 %v352_v11, %s2187_s7  ;;  %651 = vrot.lane.b32.xlu1 %v357_v13, %s2187_s7  ;;  %v397_v35 = vcombine.low %v373_v29, %v389_v31  ;;  %v398_v36 = vcombine.high %v373_v29, %v389_v31  ;;  %v413_v37 = vcombine.low %v380_v30, %v396_v32 }
 0x1c5   : > { %v414_v38 = vcombine.high %v380_v30, %v396_v32 }
 0x1c6   : > { %v405_v40 = vrot.slane %v397_v35, %v2439_v33  ;;  %v412_v41 = vrot.slane %v398_v36, %v2439_v33  ;;  %v421_v42 = vrot.slane %v413_v37, %v2439_v33 }
 0x1c7   : > { %v428_v43 = vrot.slane %v414_v38, %v2439_v33 }
 0x1c8   : > { %v433_v54 = vcombine.low %v405_v40, %v412_v41  ;;  %v1793_v55 = vcombine.high %v405_v40, %v412_v41 }
 0x1c9   : > { %v449_v56 = vcombine.low %v421_v42, %v428_v43  ;;  %v1794_v57 = vcombine.high %v421_v42, %v428_v43 }
 0x1ca   : > { %v440_v4 = vrot.slane %v433_v54, %v2431_v25  ;;  %v448_v5 = vrot.slane %v1793_v55, %v2431_v25 }
 0x1cb   : > { %v456_v6 = vrot.slane %v449_v56, %v2431_v25  ;;  %v464_v7 = vrot.slane %v1794_v57, %v2431_v25 }
 0x1cc   : > { %v465_v18 = vcombine.low %v440_v4, %v448_v5  ;;  %v466_v30 = vcombine.high %v440_v4, %v448_v5 }
 0x1cd   : > { %v481_v19 = vcombine.low %v456_v6, %v464_v7  ;;  %v482_v31 = vcombine.high %v456_v6, %v464_v7 }
 0x1ce   : > { %v473_v24 = vrot.slane %v465_v18, %v2439_v33  ;;  %v480_v38 = vrot.slane %v466_v30, %v2439_v33 }
 0x1cf   : > { %v489_v26 = vrot.slane %v481_v19, %v2439_v33 }
 0x1d1   : > { %v497_v32 = vcombine.low %v473_v24, %v489_v26  ;;  %v498_v37 = vcombine.high %v473_v24, %v489_v26 }
 0x22e   : > { %v504_v39 = vpop.permute.xlu0 %503 }
 0x232   : > { %v506_v44 = vpop.permute.xlu1 %505  ;;  %v508_v45 = vpop.permute.xlu0 %507 }
 0x233   : > { %v513_v46 = vcombine.low %v502_v34, %v506_v44  ;;  %v514_v47 = vcombine.high %v502_v34, %v506_v44  ;;  %v529_v48 = vcombine.low %v504_v39, %v508_v45  ;;  %v530_v49 = vcombine.high %v504_v39, %v508_v45 }
 0x234   : > { %v496_v39 = vrot.slane %v482_v31, %v2439_v33 }
 0x235   : > { %v521_v50 = vrot.slane %v513_v46, %v2431_v25  ;;  %v528_v51 = vrot.slane %v514_v47, %v2431_v25  ;;  %v537_v52 = vrot.slane %v529_v48, %v2431_v25  ;;  %v544_v53 = vrot.slane %v530_v49, %v2431_v25 }
 0x236   : > { %v499_v41 = vcombine.low %v480_v38, %v496_v39  ;;  %v500_v43 = vcombine.high %v480_v38, %v496_v39  ;;  %v652_v56 = vpop.permute.xlu1 %651  ;;  %v650_v57 = vpop.permute.xlu0 %649 }
 0x237   : > { %v545_v58 = vcombine.low %v521_v50, %v537_v52  ;;  %v546_v59 = vcombine.high %v521_v50, %v537_v52  ;;  %v561_v60 = vcombine.low %v528_v51, %v544_v53  ;;  %v562_v61 = vcombine.high %v528_v51, %v544_v53 }
 0x239   : > { %v553_v62 = vrot.slane %v545_v58, %v2439_v33  ;;  %v560_v63 = vrot.slane %v546_v59, %v2439_v33  ;;  %v569_v2 = vrot.slane %v561_v60, %v2439_v33  ;;  %v576_v3 = vrot.slane %v562_v61, %v2439_v33 }
 0x23b   : > { %v581_v8 = vcombine.low %v553_v62, %v560_v63  ;;  %v1795_v9 = vcombine.high %v553_v62, %v560_v63  ;;  %v597_v10 = vcombine.low %v569_v2, %v576_v3  ;;  %v1796_v11 = vcombine.high %v569_v2, %v576_v3 }
 0x23d   : > { %v588_v12 = vrot.slane %v581_v8, %v2431_v25  ;;  %v596_v13 = vrot.slane %v1795_v9, %v2431_v25  ;;  %v604_v16 = vrot.slane %v597_v10, %v2431_v25  ;;  %v612_v17 = vrot.slane %v1796_v11, %v2431_v25 }
 0x23f   : > { %v613_v20 = vcombine.low %v588_v12, %v596_v13  ;;  %v629_v21 = vcombine.low %v604_v16, %v612_v17  ;;  %v614_v27 = vcombine.high %v588_v12, %v596_v13  ;;  %v630_v28 = vcombine.high %v604_v16, %v612_v17 }
 0x241   : > { %v621_v22 = vrot.slane %v613_v20, %v2439_v33  ;;  %v637_v23 = vrot.slane %v629_v21, %v2439_v33  ;;  %v628_v35 = vrot.slane %v614_v27, %v2439_v33  ;;  %v644_v36 = vrot.slane %v630_v28, %v2439_v33 }
 0x243   : > { %v645_v29 = vcombine.low %v621_v22, %v637_v23  ;;  %v646_v34 = vcombine.high %v621_v22, %v637_v23  ;;  %v647_v40 = vcombine.low %v628_v35, %v644_v36  ;;  %v648_v42 = vcombine.high %v628_v35, %v644_v36 }
 0x245   : > { %1857 = vmatpush3.xpose.msk.msra.mxu1 %vm797_vm2, %v645_v29 }
 0x246   : > { %1861 = vmatprep.subr.mxu1 %v2182_v1 }
 0x248   : > { %1859 = vmatmul.mubr.msk.f32.vlgmr.msra.gmra.mrb[0].mxu1 %vm797_vm2, %v497_v32 }
 0x249   : > { %1862 = vmatpush3.xpose.msk.msra.mxu1 %vm797_vm2, %v646_v34  ;;  %1863 = vmatprep.mubr.msk.f32.mxu1 %vm2181_vm0, %v2182_v1 }
 0x24a   : > { %1866 = vmatprep.subr.mxu1 %v2182_v1 }
 0x24c   : > { %1864 = vmatmul.mubr.msk.f32.vlgmr.msra.gmra.mrb[2].mxu1 %vm797_vm2, %v498_v37 }
 0x24d   : > { %1867 = vmatpush3.xpose.msk.msra.mxu1 %vm797_vm2, %v647_v40  ;;  %1868 = vmatprep.mubr.msk.f32.mxu1 %vm2181_vm0, %v2182_v1 }
 0x24e   : > { %1871 = vmatprep.subr.mxu1 %v2182_v1 }
 0x250   : > { %1869 = vmatmul.mubr.msk.f32.vlgmr.msra.gmra.mrb[4].mxu1 %vm797_vm2, %v499_v41 }
 0x251   : > { %1872 = vmatpush3.xpose.msk.msra.mxu1 %vm797_vm2, %v648_v42  ;;  %1873 = vmatprep.mubr.msk.f32.mxu1 %vm2181_vm0, %v2182_v1 }
 0x252   : > { %1881 = vmatprep.subr.mxu1 %v2182_v1 }
 0x254   : > { %1874 = vmatmul.mubr.msk.f32.vlgmr.msra.gmra.mrb[6].mxu1 %vm797_vm2, %v500_v43 }
 0x255   : > { %1883 = vmatprep.mubr.msk.f32.mxu1 %vm2181_vm0, %v2182_v1 }
 0x31b   : > { %v870_v44 = vpop.f32.mrb[0].mxu1 }
 0x31c   : > { %v1860_v45 = vpop.f32.mrb[1].mxu1  ;;  %v1102_v46 = vsel %vm797_vm2, %v870_v44, -inf }
 0x31d   : > { %1103 = vmax.xlane.f32.xlu1 %v1102_v46 }
 0x31f   : > { %v946_v47 = vpop.f32.mrb[2].mxu1 }
 0x320   : > { %v1865_v48 = vpop.f32.mrb[3].mxu1  ;;  %v1105_v49 = vsel %vm797_vm2, %v946_v47, -inf }
 0x321   : > { %1106 = vmax.xlane.f32.xlu0 %v1105_v49 }
 0x323   : > { %v1022_v50 = vpop.f32.mrb[4].mxu1 }
 0x324   : > { %v1870_v51 = vpop.f32.mrb[5].mxu1  ;;  %v1108_v52 = vsel %vm797_vm2, %v1022_v50, -inf }
 0x325   : > { %1109 = vmax.xlane.f32.xlu0 %v1108_v52 }
 0x327   : > { %v1098_v53 = vpop.f32.mrb[6].mxu1 }
 0x328   : > { %v1875_v54 = vpop.f32.mrb[7].mxu1  ;;  %v1111_v55 = vsel %vm797_vm2, %v1098_v53, -inf }
 0x329   : > { %1112 = vmax.xlane.f32.xlu1 %v1111_v55 }
 0x33a   : > { %653 = vrot.lane.b32.xlu1 %v2423_v15, %s2187_s7 }
 0x33b   : > { %655 = vrot.lane.b32.xlu0 %v2421_v14, %s2187_s7  ;;  %s2109_s7 = scalar_lea.vmem %s2108_s13, 256 }
 0x33c   : > { %p2111_p9 = scmp.lt.s32.totalorder %s2109_s7, %s2103_s28 }
 0x33e   : > { %p2112_p12 = por %p2111_p9, %p2110_p7 }
 0x340   : > { %p2113_p2 = pnand %p2112_p12, %p2106_p3 }
 0x3aa   : > { %v1104_v58 = vpop.xlane.xlu1 %1103 }
 0x3ab   : > { %v1114_v59 = vsub.f32 %v870_v44, %v1104_v58 }
 0x3ad   : > { %v1118_v60 = vmul.f32 1.442695, %v1114_v59 }
 0x3ae   : > { %v1107_v61 = vpop.xlane.xlu0 %1106 }
 0x3af   : > { %2001 = vpow2.f32 %v1118_v60  ;;  %v1115_v62 = vsub.f32 %v946_v47, %v1107_v61 }
 0x3b1   : > { %v1120_v63 = vmul.f32 1.442695, %v1115_v62 }
 0x3b2   : > { %v1110_v2 = vpop.xlane.xlu0 %1109 }
 0x3b3   : > { %2003 = vpow2.f32 %v1120_v63  ;;  %v1116_v3 = vsub.f32 %v1022_v50, %v1110_v2 }
 0x3b5   : > { %v1122_v4 = vmul.f32 1.442695, %v1116_v3 }
 0x3b6   : > { %v1113_v5 = vpop.xlane.xlu1 %1112  ;;  %v656_v6 = vpop.permute.xlu0 %655 }
 0x3b7   : > { %2005 = vpow2.f32 %v1122_v4  ;;  %v1117_v15 = vsub.f32 %v1098_v53, %v1113_v5  ;;  %v677_v14 = vcombine.low %v652_v56, %v656_v6  ;;  %v678_v9 = vcombine.high %v652_v56, %v656_v6  ;;  %v1591_v56 = vld [vmem:[#allocation7] sm:$0xff] }
 0x3b9   : > { %v2002_v7 = vpop.eup %2001  ;;  %v1124_v8 = vmul.f32 1.442695, %v1117_v15  ;;  %v685_v17 = vrot.slane %v677_v14, %v2431_v25  ;;  %v692_v18 = vrot.slane %v678_v9, %v2431_v25 }
 0x3ba   : > { %v654_v10 = vpop.permute.xlu1 %653  ;;  %v1126_v11 = vsel %vm797_vm2, %v2002_v7, 0.0 }
 0x3bb   : > { %2007 = vpow2.f32 %v1124_v8  ;;  %v661_v12 = vcombine.low %v650_v57, %v654_v10  ;;  %v662_v13 = vcombine.high %v650_v57, %v654_v10  ;;  %1127 = vadd.xlane.f32.xlu1 %v1126_v11  ;;  %v1592_v57 = vld [vmem:[#allocation7 + $0x8] sm:$0xff] }
 0x3bc   : > { %v1914_v58 = vpack.c.bf16 %v1592_v57, %v1591_v56 }
 0x3bd   : > { %v2004_v16 = vpop.eup %2003  ;;  %v669_v19 = vrot.slane %v661_v12, %v2431_v25  ;;  %v676_v20 = vrot.slane %v662_v13, %v2431_v25 }
 0x3be   : > { %v1129_v21 = vsel %vm797_vm2, %v2004_v16, 0.0 }
 0x3bf   : > { %v693_v22 = vcombine.low %v669_v19, %v685_v17  ;;  %v694_v23 = vcombine.high %v669_v19, %v685_v17  ;;  %v709_v24 = vcombine.low %v676_v20, %v692_v18  ;;  %v710_v26 = vcombine.high %v676_v20, %v692_v18  ;;  %1130 = vadd.xlane.f32.xlu0 %v1129_v21 }
 0x3c1   : > { %v2006_v27 = vpop.eup %2005  ;;  %v701_v28 = vrot.slane %v693_v22, %v2439_v33  ;;  %v708_v29 = vrot.slane %v694_v23, %v2439_v33  ;;  %v717_v30 = vrot.slane %v709_v24, %v2439_v33  ;;  %v724_v31 = vrot.slane %v710_v26, %v2439_v33 }
 0x3c2   : > { %v1132_v32 = vsel %vm797_vm2, %v2006_v27, 0.0 }
 0x3c3   : > { %v729_v34 = vcombine.low %v701_v28, %v708_v29  ;;  %v1797_v35 = vcombine.high %v701_v28, %v708_v29  ;;  %v745_v36 = vcombine.low %v717_v30, %v724_v31  ;;  %v1798_v37 = vcombine.high %v717_v30, %v724_v31  ;;  %1133 = vadd.xlane.f32.xlu0 %v1132_v32  ;;  %v1593_v28 = vld [vmem:[#allocation7 + $0x10] sm:$0xff]  ;;  %v1594_v29 = vld [vmem:[#allocation7 + $0x18] sm:$0xff] }
 0x3c5   : > { %v2008_v38 = vpop.eup %2007  ;;  %v736_v39 = vrot.slane %v729_v34, %v2431_v25  ;;  %v744_v40 = vrot.slane %v1797_v35, %v2431_v25  ;;  %v752_v41 = vrot.slane %v745_v36, %v2431_v25  ;;  %v760_v42 = vrot.slane %v1798_v37, %v2431_v25 }
 0x3c6   : > { %v1135_v43 = vsel %vm797_vm2, %v2008_v38, 0.0  ;;  %v1917_v35 = vpack.c.bf16 %v1594_v29, %v1593_v28 }
 0x3c7   : > { %1136 = vadd.xlane.f32.xlu1 %v1135_v43  ;;  %v761_v44 = vcombine.low %v736_v39, %v744_v40  ;;  %v777_v45 = vcombine.low %v752_v41, %v760_v42  ;;  %v762_v46 = vcombine.high %v736_v39, %v744_v40  ;;  %v778_v47 = vcombine.high %v752_v41, %v760_v42 }
 0x3c9   : > { %v769_v48 = vrot.slane %v761_v44, %v2439_v33  ;;  %v785_v49 = vrot.slane %v777_v45, %v2439_v33  ;;  %v776_v50 = vrot.slane %v762_v46, %v2439_v33  ;;  %v792_v51 = vrot.slane %v778_v47, %v2439_v33 }
 0x3cb   : > { %v793_v52 = vcombine.low %v769_v48, %v785_v49  ;;  %v794_v53 = vcombine.high %v769_v48, %v785_v49  ;;  %v795_v54 = vcombine.low %v776_v50, %v792_v51  ;;  %v796_v55 = vcombine.high %v776_v50, %v792_v51 }
 0x3cd   : > { %1877 = vmatpush3.msra.mxu0 %v793_v52  ;;  %1882 = vmatpush3.msra.mxu1 %v794_v53 }
 0x3ce   : > { %1879 = vmatmul.mubr.msk.f32.vlgmr.msra.gmra.mrb[2].mxu0 %vm797_vm2, %v2002_v7  ;;  %1884 = vmatmul.mubr.msk.f32.vlgmr.msra.gmra.mrb[8].mxu1 %vm797_vm2, %v2004_v16 }
 0x3cf   : > { %1886 = vmatprep.subr.mxu0 %v2182_v1  ;;  %1891 = vmatprep.subr.mxu1 %v2182_v1 }
 0x3d0   : > { %1887 = vmatpush3.msra.mxu0 %v795_v54  ;;  %1892 = vmatpush3.msra.mxu1 %v796_v55 }
 0x3d1   : > { %1888 = vmatprep.mubr.msk.f32.mxu0 %vm2181_vm0, %v2182_v1  ;;  %1893 = vmatprep.mubr.msk.f32.mxu1 %vm2181_vm0, %v2182_v1 }
 0x3d2   : > { %1889 = vmatmul.mubr.msk.f32.vlgmr.msra.gmra.mrb[4].mxu0 %vm797_vm2, %v2006_v27  ;;  %1894 = vmatmul.mubr.msk.f32.vlgmr.msra.gmra.mrb[10].mxu1 %vm797_vm2, %v2008_v38 }
 0x3d3   : > { %1913 = vmatprep.subr.bf16.mxu0 %v2180_v0  ;;  %1904 = vmatprep.mubr.msk.f32.mxu0 %vm2181_vm0, %v2182_v1 }
 0x3d4   : > { %1915 = vmatpush3.bf16.msra.mxu0 %v1914_v58 }
 0x3d5   : > { %1916 = vmatprep.subr.bf16.mxu0 %v2180_v0 }
 0x3d8   : > { %1918 = vmatpush3.bf16.msra.mxu0 %v1917_v35 }
 0x448   : > { %v1128_v60 = vpop.xlane.xlu1 %1127 }
 0x449   : > { %2009 = vrcp.f32 %v1128_v60  ;;  %v1813_v60 = vld [vmem:[%s2606_s4] ss:$0 sm:$0xff] }
 0x44c   : > { %v1131_v59 = vpop.xlane.xlu0 %1130 }
 0x44d   : > { %2011 = vrcp.f32 %v1131_v59 }
 0x450   : > { %v1134_v61 = vpop.xlane.xlu0 %1133 }
 0x451   : > { %2013 = vrcp.f32 %v1134_v61 }
 0x453   : > { %v2010_v3 = vpop.eup %2009 }
 0x454   : > { %v1137_v62 = vpop.xlane.xlu1 %1136 }
 0x455   : > { %2015 = vrcp.f32 %v1137_v62 }
 0x457   : > { %v2012_v1 = vpop.eup %2011 }
 0x45b   : > { %v2014_v6 = vpop.eup %2013 }
 0x45f   : > { %v2016_v15 = vpop.eup %2015 }
 0x4a1   : > { %v1207_v63 = vpop.f32.mrb[2].mxu0  ;;  %v1280_v2 = vpop.f32.mrb[8].mxu1 }
 0x4a2   : > { %v1880_v4 = vpop.f32.mrb[3].mxu0  ;;  %v1885_v5 = vpop.f32.mrb[9].mxu1  ;;  %v1434_v14 = vmul.f32 %v2010_v3, %v1207_v63  ;;  %v1435_v0 = vmul.f32 %v2012_v1, %v1280_v2 }
 0x4a5   : > { %v1353_v7 = vpop.f32.mrb[4].mxu0  ;;  %v1426_v8 = vpop.f32.mrb[10].mxu1 }
 0x4a6   : > { %v1436_v9 = vmul.f32 %v2014_v6, %v1353_v7  ;;  %v1437_v10 = vmul.f32 %v2016_v15, %v1426_v8  ;;  %v1890_v11 = vpop.f32.mrb[5].mxu0  ;;  %v1895_v12 = vpop.f32.mrb[11].mxu1 }
 0x4a8   : > { %v1438_v13 = vcombine.low %v1434_v14, %v1436_v9  ;;  %v1439_v16 = vcombine.high %v1434_v14, %v1436_v9  ;;  %v1454_v17 = vcombine.low %v1435_v0, %v1437_v10  ;;  %v1455_v18 = vcombine.high %v1435_v0, %v1437_v10 }
 0x4aa   : > { %v1446_v19 = vrot.slane %v1438_v13, %v2431_v25  ;;  %v1453_v20 = vrot.slane %v1439_v16, %v2431_v25  ;;  %v1462_v21 = vrot.slane %v1454_v17, %v2431_v25  ;;  %v1469_v22 = vrot.slane %v1455_v18, %v2431_v25 }
 0x4ac   : > { %v1470_v23 = vcombine.low %v1446_v19, %v1462_v21  ;;  %v1471_v24 = vcombine.high %v1446_v19, %v1462_v21  ;;  %v1486_v26 = vcombine.low %v1453_v20, %v1469_v22  ;;  %v1487_v27 = vcombine.high %v1453_v20, %v1469_v22 }
 0x4ae   : > { %v1478_v30 = vrot.slane %v1470_v23, %v2439_v33  ;;  %v1485_v31 = vrot.slane %v1471_v24, %v2439_v33  ;;  %v1494_v32 = vrot.slane %v1486_v26, %v2439_v33  ;;  %v1501_v34 = vrot.slane %v1487_v27, %v2439_v33 }
 0x4b0   : > { %v1506_v36 = vcombine.low %v1478_v30, %v1485_v31  ;;  %v1811_v37 = vcombine.high %v1478_v30, %v1485_v31  ;;  %v1522_v38 = vcombine.low %v1494_v32, %v1501_v34  ;;  %v1812_v39 = vcombine.high %v1494_v32, %v1501_v34 }
 0x4b2   : > { %v1513_v40 = vrot.slane %v1506_v36, %v2431_v25  ;;  %v1521_v41 = vrot.slane %v1811_v37, %v2431_v25  ;;  %v1529_v42 = vrot.slane %v1522_v38, %v2431_v25  ;;  %v1537_v43 = vrot.slane %v1812_v39, %v2431_v25 }
 0x4b4   : > { %v1539_v44 = vcombine.high %v1513_v40, %v1521_v41  ;;  %v1555_v45 = vcombine.high %v1529_v42, %v1537_v43  ;;  %v1538_v46 = vcombine.low %v1513_v40, %v1521_v41  ;;  %v1554_v47 = vcombine.low %v1529_v42, %v1537_v43 }
 0x4b6   : > { %v1553_v48 = vrot.slane %v1539_v44, %v2439_v33  ;;  %v1569_v49 = vrot.slane %v1555_v45, %v2439_v33  ;;  %v1546_v50 = vrot.slane %v1538_v46, %v2439_v33  ;;  %v1562_v51 = vrot.slane %v1554_v47, %v2439_v33 }
 0x4b8   : > { %v1572_v52 = vcombine.low %v1553_v48, %v1569_v49  ;;  %v1571_v53 = vcombine.high %v1546_v50, %v1562_v51  ;;  %v1573_v54 = vcombine.high %v1553_v48, %v1569_v49  ;;  %v1570_v55 = vcombine.low %v1546_v50, %v1562_v51 }
 0x4ba   : > { %1579 = vrot.lane.b32.xlu1 %v1572_v52, %s2190_s6  ;;  %1575 = vrot.lane.b32.xlu0 %v1571_v53, %s2191_s30 }
 0x4be   : > { %1583 = vrot.lane.b32.xlu1 %v1573_v54, %s2192_s15 }
 0x52c   : > { %v1580_v25 = vpop.permute.xlu1 %1579  ;;  %v1576_v56 = vpop.permute.xlu0 %1575 }
 0x52d   : > { %v1586_v57 = vsel %vm797_vm2, %v1570_v55, %v1576_v56 }
 0x52e   : > { %v1588_v58 = vsel %vm1587_vm3, %v1586_v57, %v1580_v25 }
 0x530   : > { %v1584_v33 = vpop.permute.xlu1 %1583 }
 0x531   : > { %v1590_v59 = vsel %vm1589_vm4, %v1588_v58, %v1584_v33 }
 0x532   : > { %1905 = vmatmul.mubr.msk.f32.vlgmr.msra.gmra.mrb[6].mxu0 %vm281_vm1, %v1590_v59 }
 0x605   : > { %v1671_v61 = vpop.f32.mrb[6].mxu0 }
 0x606   : > { %v1672_v62 = vadd.f32 %v1813_v60, %v1671_v61  ;;  %v1906_v63 = vpop.f32.mrb[7].mxu0 }
 0x608   : > { %1675 = vst [vmem:[%s268_s17] sm:$0xff] %v1672_v62 }
 0x609   : > { %2116 = shalt.err (!%p2113_p2)
}
 0x60a   : > { %s2117_s12 = scalar_lea.hbm %s2558_s10, 128  ;;  %s2121_s15 = scalar_lea.hbm %s2607_s5, 256 }
 0x60b   : > { %p2118_p13 = scmp.ne.s32.totalorder %s2558_s10, %s2117_s12  ;;  %p2122_p4 = scmp.lt.u32.totalorder %s2558_s10, %s2607_s5 }
 0x60c   : > { %p2123_p5 = scmp.lt.u32.totalorder %s2121_s15, %s2117_s12  ;;  %p2125_p11 = scmp.lt.u32.totalorder %s2117_s12, %s2558_s10 }
 0x60d   : > { %p2119_p6 = pnand %p2118_p13, %p2621_p0 }
 0x60e   : > { %p2124_p8 = por %p2123_p5, %p2122_p4 }
 0x60f   : > { %p2120_p10 = pneg %p2119_p6 }
 0x610   : > { %p2126_p1 = por %p2125_p11, %p2124_p8 }
 0x612   : > { %p2127_p3 = pnand %p2126_p1, %p2120_p10 }
 0x614   : > { %2130 = shalt.err (!%p2127_p3)
}
 0x615   : > { %1929 = dma.vmem_to_hbm [thread:$0]  (%p2621_p0), %s2560_s24, 128, %s2558_s10, %s1677_s11  }
 0x616 PF: > { %s1702_s29 = sand.u32 1, %s2161_s18   ;;  %p2622_p7 = scmp.ne.s32.totalorder %s2612_s25, 0 }
 0x617   : > { %p2623_p9 = scmp.ge.s32.totalorder %s2173_s21, 2  ;;  %s1703_s17 = scalar_lea.sflag [#allocation4], %s1702_s29 }
 0x619   : > { %p1943_p12 = pnand %p2623_p9, %p2622_p7 }
 0x61b   : > { %2156 = dma.done.wait (!%p1943_p12), %s1703_s17, 128  }
 0x61c   : > { %2158 = vsyncadd (!%p1943_p12), %s1703_s17, 4294967168  ;;  %p19_p2 = scmp.ge.s32.totalorder %s2334_s14, 4   ;;  %s2624_s18 = smov %s2165_s19 }
 0x61d   : > { %s2625_s19 = smov %s2169_s20  ;;  %s2626_s20 = smov %s2350_s27 }
 0x61e   : > { %s2627_s21 = smov %s2334_s14  ;;  %21 = sbr.rel (!%p19_p2) target bundleno = 6 (0x6), region = 93 }
 0x625   :  { %1708 = vsyncpa [#allocation3], 1 }
 0x626   :  { %1710 = vsyncpa [#allocation3 + $0x1], 1 }
 0x627   :  { %1711 = vsyncpa [#allocation6], 1 }
 0x628   :  { %1712 = vsyncpa [#allocation4], 1 }
 0x629   :  { %1714 = vsyncpa [#allocation4 + $0x1], 1 }

// kernel: tpu_custom_call.1
= control target key start
LH: loop header
LB: loop body
LE: loop exit
PB: predicated region body
PF: predicated region fallthrough
CT: control target
= control target key end

     0   :  { %10 = vsyncpa [#allocation3], 0  ;;  %s2602_s0 = inlined_call_operand.hbm [shape: f32[2,8,32], index: 0, kind: input, shape index: {}]   ;;  %s2603_s1 = inlined_call_operand.hbm [shape: f32[32,96], index: 1, kind: input, shape index: {}]   ;;  %s2604_s2 = inlined_call_operand.vmem [shape: f32[1,96], index: 2, kind: input, shape index: {}]   ;;  %s2605_s3 = inlined_call_operand.hbm [shape: f32[32,128], index: 3, kind: input, shape index: {}]   ;;  %s2606_s4 = inlined_call_operand.vmem [shape: f32[1,128], index: 4, kind: input, shape index: {}]   ;;  %s2607_s5 = inlined_call_operand.hbm [shape: f32[2,8,128], index: 5, kind: output, shape index: {}]  }
   0x1   :  { %12 = vsyncpa [#allocation3 + $0x1], 0 }
   0x2   :  { %13 = vsyncpa [#allocation6], 0 }
   0x3   :  { %14 = vsyncpa [#allocation4], 0 }
   0x4   :  { %16 = vsyncpa [#allocation4 + $0x1], 0  ;;  %s2224_s18 = smov 0   ;;  %s2226_s19 = smov 0  }
   0x5   :  { %s2228_s20 = smov 0   ;;  %s2230_s21 = smov 0  }
   0x6 LB: > { %s2245_s22 = sadd.s32 4294967295, %s2173_s21   ;;  %s1779_s23 = sadd.s32 4294967294, %s2173_s21   ;;  %s2173_s21 = sphi %s2230_s21, %s2627_s21   ;;  %s2169_s20 = sphi %s2228_s20, %s2626_s20   ;;  %s2165_s19 = sphi %s2226_s19, %s2625_s19   ;;  %s2161_s18 = sphi %s2224_s18, %s2624_s18  }
   0x7   : > { %p42_p0 = scmp.ne.s32.totalorder %s2165_s19, %s2161_s18  ;;  %p2608_p1 = scmp.eq.s32.totalorder %s2245_s22, 0 }
   0x8   : > { %p156_p3 = scmp.eq.s32.totalorder %s1779_s23, 1  ;;  %p1780_p5 = scmp.ge.s32.totalorder %s2173_s21, 1 }
   0x9   : > { %p2254_p4 = por %p2608_p1, %p42_p0  ;;  %p163_p7 = scmp.lt.s32.totalorder %s2173_s21, 3 }
   0xa   : > { %p2259_p6 = por %p156_p3, %p42_p0  ;;  %s2175_s27 = smov [#allocation5]  }
   0xb   : > { %s2611_s24 = scalar_select %p2254_p4, 1, 0 }
   0xc   : > { %s2612_s25 = scalar_select %p2259_p6, 1, 0 }
   0xd   : > { %p2264_p8 = pnand %p1780_p5, %p163_p7  ;;  %s175_s28 = sshll.u32 %s2175_s27, 4  ;;  %s2268_s28 = int_to_ptr.vmem [resolvable:$true] %s175_s28 }
   0xe   : > { %s2176_s30 = smov [#allocation7]   ;;  %s2017_s9 = scalar_lea.hbm %s2603_s1, 512 }
   0xf   : > { %p1931_p9 = pneg %p2264_p8  ;;  %s191_s6 = sshll.u32 %s2176_s30, 4  ;;  %s2279_s6 = int_to_ptr.vmem [resolvable:$true] %s191_s6 }
  0x10   : > { %p2018_p12 = scmp.ne.s32.totalorder %s2603_s1, %s2017_s9  ;;  %p2024_p5 = scmp.lt.u32.totalorder %s2017_s9, %s2603_s1 }
  0x11   : > { %p2275_p11 = pnand %p1931_p9, %p2608_p1 }
  0x13   : > { %p2019_p13 = pneg %p2275_p11 }
  0x15   : > { %p2020_p0 = pnand %p2019_p13, %p2018_p12 }
  0x17   : > { %p2021_p3 = pneg %p2020_p0 }
  0x19   : > { %p2026_p7 = pnand %p2024_p5, %p2021_p3 }
  0x1b   : > { %2029 = shalt.err (!%p2026_p7)
}
  0x1c   : > { %s2030_s14 = scalar_lea.vmem %s2268_s28, 512  ;;  %p2038_p2 = scmp.lt.s32.totalorder %s2268_s28, %s2268_s28 }
  0x1d   : > { %p2031_p9 = scmp.ne.s32.totalorder %s2268_s28, %s2030_s14  ;;  %p2039_p12 = scmp.lt.s32.totalorder %s2030_s14, %s2030_s14 }
  0x1f   : > { %p2033_p10 = pnand %p2031_p9, %p2019_p13  ;;  %p2040_p0 = por %p2039_p12, %p2038_p2 }
  0x21   : > { %p2034_p1 = pneg %p2033_p10 }
  0x23   : > { %p2041_p6 = pnand %p2040_p0, %p2034_p1 }
  0x25   : > { %2044 = shalt.err (!%p2041_p6)
}
  0x26   : > { %s2177_s15 = smov 128   ;;  %s2178_s16 = smov 8  }
  0x27   : > { %1934 = dma.hbm_to_vmem [thread:$0]  (!%p2275_p11), %s2603_s1, 512, %s2268_s28, [#allocation6], %s2177_s15, %s2177_s15, %s2178_s16  }
  0x28   : > { %s2045_s7 = scalar_lea.hbm %s2605_s3, 512 }
  0x29   : > { %p2046_p2 = scmp.ne.s32.totalorder %s2605_s3, %s2045_s7  ;;  %p2052_p10 = scmp.lt.u32.totalorder %s2045_s7, %s2605_s3 }
  0x2b   : > { %p2048_p1 = pnand %p2046_p2, %p2019_p13 }
  0x2d   : > { %p2049_p6 = pneg %p2048_p1 }
  0x2f   : > { %p2054_p3 = pnand %p2052_p10, %p2049_p6 }
  0x31   : > { %2057 = shalt.err (!%p2054_p3)
}
  0x32   : > { %s2058_s28 = scalar_lea.vmem %s2279_s6, 512  ;;  %p2066_p12 = scmp.lt.s32.totalorder %s2279_s6, %s2279_s6 }
  0x33   : > { %p2059_p5 = scmp.ne.s32.totalorder %s2279_s6, %s2058_s28  ;;  %p2067_p0 = scmp.lt.s32.totalorder %s2058_s28, %s2058_s28 }
  0x35   : > { %p2061_p7 = pnand %p2059_p5, %p2019_p13  ;;  %p2068_p2 = por %p2067_p0, %p2066_p12 }
  0x37   : > { %p2062_p9 = pneg %p2061_p7 }
  0x39   : > { %p2069_p1 = pnand %p2068_p2, %p2062_p9 }
  0x3b   : > { %2072 = shalt.err (!%p2069_p1)
}
  0x3c   : > { %1937 = dma.hbm_to_vmem [thread:$0]  (!%p2275_p11), %s2605_s3, 512, %s2279_s6, [#allocation6], %s2177_s15, %s2177_s15, %s2178_s16  }
  0x3d   : > { %s2334_s14 = sadd.s32 1, %s2173_s21   ;;  %s29_s29 = sadd.s32 1, %s2169_s20 }
  0x3e   : > { %s26_s17 = ssub.s32 %s2173_s21, %s2334_s14  ;;  %p36_p13 = scmp.ne.s32.totalorder %s2169_s20, %s2165_s19 }
  0x3f   : > { %p27_p6 = scmp.eq.s32.totalorder %s26_s17, 0  ;;  %p37_p10 = scmp.eq.s32.totalorder %s2173_s21, 0 }
  0x40   : > { %p2615_p3 = scmp.eq.s32.totalorder %s2245_s22, 1  ;;  %p1948_p7 = scmp.lt.s32.totalorder %s2173_s21, 2 }
  0x41   : > { %s2350_s27 = scalar_select %p27_p6, %s2169_s20, %s29_s29  }
  0x42   : > { %p2344_p5 = por %p2615_p3, %p36_p13  ;;  %p38_p9 = por %p37_p10, %p36_p13 }
  0x43   : > { %s208_s30 = sand.u32 1, %s2169_s20   ;;  %s1785_s6 = sshll.u32 %s2173_s21, 7 }
  0x44   : > { %s2616_s23 = scalar_select %p2344_p5, 1, 0 }
  0x45   : > { %s1784_s7 = sshll.u32 %s208_s30, 3  ;;  %s2357_s8 = scalar_lea.hbm %s2602_s0, %s1785_s6 }
  0x46   : > { %s212_s9 = scalar_lea.vmem [#allocation2], %s1784_s7  ;;  %p2361_p11 = pnand %p1948_p7, %p38_p9 }
  0x47   : > { %s219_s10 = sshll.u32 %s212_s9, 4  ;;  %s209_s28 = scalar_lea.sflag [#allocation3], %s208_s30  ;;  %s2359_s10 = int_to_ptr.vmem [resolvable:$true] %s219_s10 }
  0x48   : > { %s2073_s12 = scalar_lea.hbm %s2357_s8, 128  ;;  %p2075_p0 = pneg %p2361_p11 }
  0x49   : > { %p2074_p12 = scmp.ne.s32.totalorder %s2357_s8, %s2073_s12  ;;  %s2078_s17 = scalar_lea.hbm %s2602_s0, 256 }
  0x4a   : > { %p2079_p13 = scmp.lt.u32.totalorder %s2357_s8, %s2602_s0  ;;  %p2080_p6 = scmp.lt.u32.totalorder %s2078_s17, %s2073_s12 }
  0x4b   : > { %p2076_p2 = pnand %p2075_p0, %p2074_p12  ;;  %p2082_p3 = scmp.lt.u32.totalorder %s2073_s12, %s2357_s8 }
  0x4c   : > { %p2081_p10 = por %p2080_p6, %p2079_p13 }
  0x4d   : > { %p2077_p1 = pneg %p2076_p2 }
  0x4e   : > { %p2083_p7 = por %p2082_p3, %p2081_p10 }
  0x50   : > { %p2084_p9 = pnand %p2083_p7, %p2077_p1 }
  0x52   : > { %2087 = shalt.err (!%p2084_p9)
}
  0x53   : > { %s2088_s30 = scalar_lea.vmem %s2359_s10, 128  ;;  %s2179_s15 = smov [#allocation2]  }
  0x54   : > { %p2089_p12 = scmp.ne.s32.totalorder %s2359_s10, %s2088_s30  ;;  %s2093_s16 = sshll.u32 %s2179_s15, 4  ;;  %s2094_s16 = int_to_ptr.vmem [resolvable:$false] %s2093_s16 }
  0x55   : > { %s2095_s9 = scalar_lea.vmem %s2094_s16, 256  ;;  %p2096_p4 = scmp.lt.s32.totalorder %s2359_s10, %s2094_s16 }
  0x56   : > { %p2091_p2 = pnand %p2089_p12, %p2075_p0  ;;  %p2097_p13 = scmp.lt.s32.totalorder %s2095_s9, %s2088_s30 }
  0x58   : > { %p2092_p5 = pneg %p2091_p2  ;;  %p2098_p6 = por %p2097_p13, %p2096_p4 }
  0x5a   : > { %p2099_p10 = pnand %p2098_p6, %p2092_p5 }
  0x5c   : > { %2102 = shalt.err (!%p2099_p10)
}
  0x5d   : > { %1941 = dma.hbm_to_vmem [thread:$0]  (!%p2361_p11), %s2357_s8, 128, %s2359_s10, %s209_s28  }
  0x5e   : > { %228 = sbr.rel (%p2264_p8) target bundleno = 1558 (0x616), region = 40  ;;  %s2393_s12 = sand.u32 (!%p2264_p8), 1, %s2165_s19  }
  0x5f   : > { %s1787_s13 = sshll.u32 (!%p2264_p8), %s2393_s12, 3  ;;  %s231_s29 = scalar_lea.sflag (!%p2264_p8), [#allocation3], %s2393_s12 }
  0x60   : > { %s234_s17 = scalar_lea.vmem (!%p2264_p8), [#allocation2], %s1787_s13  ;;  %p2618_p4 = scmp.ne.s32.totalorder (!%p2264_p8), %s2611_s24, 0 }
  0x65   : > { %2148 = dma.done.wait (%p2618_p4), %s231_s29, 128  }
  0x66   : > { %2150 = vsyncadd (%p2618_p4), %s231_s29, 4294967168  ;;  %p2619_p5 = scmp.eq.s32.totalorder %s2245_s22, 0 }
  0x68   : > { %2152 = dma.done.wait (%p2619_p5), [#allocation6], 1024   ;;  %p2620_p8 = pmov %p2619_p5 }
  0x69   : > { %v2180_v0 = vmov 0.0|0.0   ;;  %vm2181_vm0 = vmmov 0   ;;  %v2182_v1 = vmov 0.0   ;;  %v270_v2 = vld [vmem:[#allocation5] sm:$0xff]  ;;  %v271_v3 = vld [vmem:[#allocation5 + $0x8] sm:$0xff]  ;;  %v272_v4 = vld [vmem:[#allocation5 + $0x10] sm:$0xff]  ;;  %v370_v18 = vlaneseq }
  0x6a   : > { %2154 = vsyncadd (%p2620_p8), [#allocation6], 4294966272  ;;  %1907 = vmatprep.subr.bf16.mxu0 %v2180_v0  ;;  %1853 = vmatprep.mubr.msk.f32.mxu0 %vm2181_vm0, %v2182_v1  ;;  %v1908_v5 = vpack.c.bf16 %v271_v3, %v270_v2  ;;  %v273_v6 = vld [vmem:[#allocation5 + $0x18] sm:$0xff]  ;;  %vm281_vm1 = vcmask 261120   ;;  %v1791_v9 = vld [vmem:[%s2604_s2] ss:$0 sm:$0xff] }
  0x6b   : > { %1856 = vmatprep.subr.mxu1 %v2182_v1  ;;  %1858 = vmatprep.mubr.msk.f32.mxu1 %vm2181_vm0, %v2182_v1  ;;  %v1911_v7 = vpack.c.bf16 %v273_v6, %v272_v4  ;;  %v269_v8 = vld [vmem:[%s234_s17] sm:$0xff]  ;;  %s2183_s8 = smov 104   ;;  %s2184_s10 = smov 120   ;;  %v2188_v16 = vmov 1983009808   ;;  %v371_v20 = vshrl.u32 %v370_v18, 7 }
  0x6c   : > { %1909 = vmatpush3.bf16.msra.mxu0 %v1908_v5  ;;  %s2185_s11 = smov 96   ;;  %s2186_s28 = smov 112   ;;  %v368_v17 = vunpack.c.l.s4 %v2188_v16  ;;  %v2189_v21 = vmov 1934713408   ;;  %vm797_vm2 = vcmask 64512   ;;  %vm1587_vm3 = vcmask 130048  }
  0x6d   : > { %1910 = vmatprep.subr.bf16.mxu0 %v2180_v0  ;;  %s2187_s7 = smov 64   ;;  %v400_v22 = vunpack.c.l.s4 %v2189_v21  ;;  %s2190_s6 = smov 16   ;;  %vm1589_vm4 = vcmask 195584  }
  0x6e   : > { %v369_v19 = vunpack.c.0.s8 %v368_v17  ;;  %s2191_s30 = smov 8   ;;  %s2192_s15 = smov 24  }
  0x6f   : > { %v401_v28 = vunpack.c.0.s8 %v400_v22  ;;  %s1816_s29 = sshll.u32 %s2245_s22, 7  ;;  %s268_s17 = scalar_lea.vmem [#allocation8], %s1787_s13 }
  0x70   : > { %1912 = vmatpush3.bf16.msra.mxu0 %v1911_v7  ;;  %v2431_v25 = vsub.s32 %v369_v19, %v371_v20  ;;  %s1690_s24 = sshll.u32 %s268_s17, 4  ;;  %p2621_p0 = scmp.ne.s32.totalorder %s2616_s23, 0  ;;  %s2560_s24 = int_to_ptr.vmem [resolvable:$true] %s1690_s24 }
  0x71   : > { %1876 = vmatprep.subr.mxu0 %v2182_v1  ;;  %v2439_v33 = vsub.s32 %v401_v28, %v371_v20  ;;  %s2193_s22 = smov [#allocation8]  }
  0x72   : > { %s2107_s13 = sshll.u32 %s2193_s22, 4  ;;  %s2108_s13 = int_to_ptr.vmem [resolvable:$false] %s2107_s13 }
  0x73   : > { %1854 = vmatmul.mubr.msk.f32.vlgmr.msra.gmra.mrb[0].mxu0 %vm281_vm1, %v269_v8  ;;  %p2110_p7 = scmp.lt.s32.totalorder %s2560_s24, %s2108_s13 }
  0x74   : > { %1878 = vmatprep.mubr.msk.f32.mxu0 %vm2181_vm0, %v2182_v1 }
 0x146   : > { %v351_v10 = vpop.f32.mrb[0].mxu0 }
 0x147   : > { %v352_v11 = vadd.f32 %v1791_v9, %v351_v10  ;;  %v1855_v12 = vpop.f32.mrb[1].mxu0 }
 0x149   : > { %362 = vrot.lane.b32.xlu1 %v352_v11, %s2183_s8  ;;  %356 = vrot.lane.b32.xlu0 %v352_v11, %s2184_s10  ;;  %s2558_s10 = scalar_lea.hbm %s2607_s5, %s1816_s29 }
 0x14d   : > { %501 = vrot.lane.b32.xlu1 %v352_v11, %s2185_s11  ;;  %359 = vrot.lane.b32.xlu0 %v352_v11, %s2186_s28  ;;  %s2103_s28 = scalar_lea.vmem %s2560_s24, 128 }
 0x14e   : > { %p2104_p11 = scmp.ne.s32.totalorder %s2560_s24, %s2103_s28 }
 0x150   : > { %p2105_p1 = pnand %p2104_p11, %p2621_p0 }
 0x152   : > { %p2106_p3 = pneg %p2105_p1 }
 0x1bb   : > { %v357_v13 = vpop.permute.xlu0 %356  ;;  %v2421_v14 = vpop.permute.xlu1 %362 }
 0x1bc   : > { %503 = vrot.lane.b32.xlu0 %v357_v13, %s2185_s11  ;;  %v381_v26 = vcombine.low %v357_v13, %v2421_v14  ;;  %v382_v27 = vcombine.high %v357_v13, %v2421_v14 }
 0x1be   : > { %v389_v31 = vrot.slane %v381_v26, %v2431_v25  ;;  %v396_v32 = vrot.slane %v382_v27, %v2431_v25 }
 0x1bf   : > { %v2423_v15 = vpop.permute.xlu0 %359  ;;  %v502_v34 = vpop.permute.xlu1 %501 }
 0x1c0   : > { %507 = vrot.lane.b32.xlu0 %v2421_v14, %s2185_s11  ;;  %505 = vrot.lane.b32.xlu1 %v2423_v15, %s2185_s11  ;;  %v365_v23 = vcombine.low %v352_v11, %v2423_v15  ;;  %v366_v24 = vcombine.high %v352_v11, %v2423_v15  ;;  %s1677_s11 = scalar_lea.sflag [#allocation4], %s2393_s12 }
 0x1c2   : > { %v373_v29 = vrot.slane %v365_v23, %v2431_v25  ;;  %v380_v30 = vrot.slane %v366_v24, %v2431_v25 }
 0x1c4   : > { %649 = vrot.lane.b32.xlu0 %v352_v11, %s2187_s7  ;;  %651 = vrot.lane.b32.xlu1 %v357_v13, %s2187_s7  ;;  %v397_v35 = vcombine.low %v373_v29, %v389_v31  ;;  %v398_v36 = vcombine.high %v373_v29, %v389_v31  ;;  %v413_v37 = vcombine.low %v380_v30, %v396_v32 }
 0x1c5   : > { %v414_v38 = vcombine.high %v380_v30, %v396_v32 }
 0x1c6   : > { %v405_v40 = vrot.slane %v397_v35, %v2439_v33  ;;  %v412_v41 = vrot.slane %v398_v36, %v2439_v33  ;;  %v421_v42 = vrot.slane %v413_v37, %v2439_v33 }
 0x1c7   : > { %v428_v43 = vrot.slane %v414_v38, %v2439_v33 }
 0x1c8   : > { %v433_v54 = vcombine.low %v405_v40, %v412_v41  ;;  %v1793_v55 = vcombine.high %v405_v40, %v412_v41 }
 0x1c9   : > { %v449_v56 = vcombine.low %v421_v42, %v428_v43  ;;  %v1794_v57 = vcombine.high %v421_v42, %v428_v43 }
 0x1ca   : > { %v440_v4 = vrot.slane %v433_v54, %v2431_v25  ;;  %v448_v5 = vrot.slane %v1793_v55, %v2431_v25 }
 0x1cb   : > { %v456_v6 = vrot.slane %v449_v56, %v2431_v25  ;;  %v464_v7 = vrot.slane %v1794_v57, %v2431_v25 }
 0x1cc   : > { %v465_v18 = vcombine.low %v440_v4, %v448_v5  ;;  %v466_v30 = vcombine.high %v440_v4, %v448_v5 }
 0x1cd   : > { %v481_v19 = vcombine.low %v456_v6, %v464_v7  ;;  %v482_v31 = vcombine.high %v456_v6, %v464_v7 }
 0x1ce   : > { %v473_v24 = vrot.slane %v465_v18, %v2439_v33  ;;  %v480_v38 = vrot.slane %v466_v30, %v2439_v33 }
 0x1cf   : > { %v489_v26 = vrot.slane %v481_v19, %v2439_v33 }
 0x1d1   : > { %v497_v32 = vcombine.low %v473_v24, %v489_v26  ;;  %v498_v37 = vcombine.high %v473_v24, %v489_v26 }
 0x22e   : > { %v504_v39 = vpop.permute.xlu0 %503 }
 0x232   : > { %v506_v44 = vpop.permute.xlu1 %505  ;;  %v508_v45 = vpop.permute.xlu0 %507 }
 0x233   : > { %v513_v46 = vcombine.low %v502_v34, %v506_v44  ;;  %v514_v47 = vcombine.high %v502_v34, %v506_v44  ;;  %v529_v48 = vcombine.low %v504_v39, %v508_v45  ;;  %v530_v49 = vcombine.high %v504_v39, %v508_v45 }
 0x234   : > { %v496_v39 = vrot.slane %v482_v31, %v2439_v33 }
 0x235   : > { %v521_v50 = vrot.slane %v513_v46, %v2431_v25  ;;  %v528_v51 = vrot.slane %v514_v47, %v2431_v25  ;;  %v537_v52 = vrot.slane %v529_v48, %v2431_v25  ;;  %v544_v53 = vrot.slane %v530_v49, %v2431_v25 }
 0x236   : > { %v499_v41 = vcombine.low %v480_v38, %v496_v39  ;;  %v500_v43 = vcombine.high %v480_v38, %v496_v39  ;;  %v652_v56 = vpop.permute.xlu1 %651  ;;  %v650_v57 = vpop.permute.xlu0 %649 }
 0x237   : > { %v545_v58 = vcombine.low %v521_v50, %v537_v52  ;;  %v546_v59 = vcombine.high %v521_v50, %v537_v52  ;;  %v561_v60 = vcombine.low %v528_v51, %v544_v53  ;;  %v562_v61 = vcombine.high %v528_v51, %v544_v53 }
 0x239   : > { %v553_v62 = vrot.slane %v545_v58, %v2439_v33  ;;  %v560_v63 = vrot.slane %v546_v59, %v2439_v33  ;;  %v569_v2 = vrot.slane %v561_v60, %v2439_v33  ;;  %v576_v3 = vrot.slane %v562_v61, %v2439_v33 }
 0x23b   : > { %v581_v8 = vcombine.low %v553_v62, %v560_v63  ;;  %v1795_v9 = vcombine.high %v553_v62, %v560_v63  ;;  %v597_v10 = vcombine.low %v569_v2, %v576_v3  ;;  %v1796_v11 = vcombine.high %v569_v2, %v576_v3 }
 0x23d   : > { %v588_v12 = vrot.slane %v581_v8, %v2431_v25  ;;  %v596_v13 = vrot.slane %v1795_v9, %v2431_v25  ;;  %v604_v16 = vrot.slane %v597_v10, %v2431_v25  ;;  %v612_v17 = vrot.slane %v1796_v11, %v2431_v25 }
 0x23f   : > { %v613_v20 = vcombine.low %v588_v12, %v596_v13  ;;  %v629_v21 = vcombine.low %v604_v16, %v612_v17  ;;  %v614_v27 = vcombine.high %v588_v12, %v596_v13  ;;  %v630_v28 = vcombine.high %v604_v16, %v612_v17 }
 0x241   : > { %v621_v22 = vrot.slane %v613_v20, %v2439_v33  ;;  %v637_v23 = vrot.slane %v629_v21, %v2439_v33  ;;  %v628_v35 = vrot.slane %v614_v27, %v2439_v33  ;;  %v644_v36 = vrot.slane %v630_v28, %v2439_v33 }
 0x243   : > { %v645_v29 = vcombine.low %v621_v22, %v637_v23  ;;  %v646_v34 = vcombine.high %v621_v22, %v637_v23  ;;  %v647_v40 = vcombine.low %v628_v35, %v644_v36  ;;  %v648_v42 = vcombine.high %v628_v35, %v644_v36 }
 0x245   : > { %1857 = vmatpush3.xpose.msk.msra.mxu1 %vm797_vm2, %v645_v29 }
 0x246   : > { %1861 = vmatprep.subr.mxu1 %v2182_v1 }
 0x248   : > { %1859 = vmatmul.mubr.msk.f32.vlgmr.msra.gmra.mrb[0].mxu1 %vm797_vm2, %v497_v32 }
 0x249   : > { %1862 = vmatpush3.xpose.msk.msra.mxu1 %vm797_vm2, %v646_v34  ;;  %1863 = vmatprep.mubr.msk.f32.mxu1 %vm2181_vm0, %v2182_v1 }
 0x24a   : > { %1866 = vmatprep.subr.mxu1 %v2182_v1 }
 0x24c   : > { %1864 = vmatmul.mubr.msk.f32.vlgmr.msra.gmra.mrb[2].mxu1 %vm797_vm2, %v498_v37 }
 0x24d   : > { %1867 = vmatpush3.xpose.msk.msra.mxu1 %vm797_vm2, %v647_v40  ;;  %1868 = vmatprep.mubr.msk.f32.mxu1 %vm2181_vm0, %v2182_v1 }
 0x24e   : > { %1871 = vmatprep.subr.mxu1 %v2182_v1 }
 0x250   : > { %1869 = vmatmul.mubr.msk.f32.vlgmr.msra.gmra.mrb[4].mxu1 %vm797_vm2, %v499_v41 }
 0x251   : > { %1872 = vmatpush3.xpose.msk.msra.mxu1 %vm797_vm2, %v648_v42  ;;  %1873 = vmatprep.mubr.msk.f32.mxu1 %vm2181_vm0, %v2182_v1 }
 0x252   : > { %1881 = vmatprep.subr.mxu1 %v2182_v1 }
 0x254   : > { %1874 = vmatmul.mubr.msk.f32.vlgmr.msra.gmra.mrb[6].mxu1 %vm797_vm2, %v500_v43 }
 0x255   : > { %1883 = vmatprep.mubr.msk.f32.mxu1 %vm2181_vm0, %v2182_v1 }
 0x31b   : > { %v870_v44 = vpop.f32.mrb[0].mxu1 }
 0x31c   : > { %v1860_v45 = vpop.f32.mrb[1].mxu1  ;;  %v1102_v46 = vsel %vm797_vm2, %v870_v44, -inf }
 0x31d   : > { %1103 = vmax.xlane.f32.xlu1 %v1102_v46 }
 0x31f   : > { %v946_v47 = vpop.f32.mrb[2].mxu1 }
 0x320   : > { %v1865_v48 = vpop.f32.mrb[3].mxu1  ;;  %v1105_v49 = vsel %vm797_vm2, %v946_v47, -inf }
 0x321   : > { %1106 = vmax.xlane.f32.xlu0 %v1105_v49 }
 0x323   : > { %v1022_v50 = vpop.f32.mrb[4].mxu1 }
 0x324   : > { %v1870_v51 = vpop.f32.mrb[5].mxu1  ;;  %v1108_v52 = vsel %vm797_vm2, %v1022_v50, -inf }
 0x325   : > { %1109 = vmax.xlane.f32.xlu0 %v1108_v52 }
 0x327   : > { %v1098_v53 = vpop.f32.mrb[6].mxu1 }
 0x328   : > { %v1875_v54 = vpop.f32.mrb[7].mxu1  ;;  %v1111_v55 = vsel %vm797_vm2, %v1098_v53, -inf }
 0x329   : > { %1112 = vmax.xlane.f32.xlu1 %v1111_v55 }
 0x33a   : > { %653 = vrot.lane.b32.xlu1 %v2423_v15, %s2187_s7 }
 0x33b   : > { %655 = vrot.lane.b32.xlu0 %v2421_v14, %s2187_s7  ;;  %s2109_s7 = scalar_lea.vmem %s2108_s13, 256 }
 0x33c   : > { %p2111_p9 = scmp.lt.s32.totalorder %s2109_s7, %s2103_s28 }
 0x33e   : > { %p2112_p12 = por %p2111_p9, %p2110_p7 }
 0x340   : > { %p2113_p2 = pnand %p2112_p12, %p2106_p3 }
 0x3aa   : > { %v1104_v58 = vpop.xlane.xlu1 %1103 }
 0x3ab   : > { %v1114_v59 = vsub.f32 %v870_v44, %v1104_v58 }
 0x3ad   : > { %v1118_v60 = vmul.f32 1.442695, %v1114_v59 }
 0x3ae   : > { %v1107_v61 = vpop.xlane.xlu0 %1106 }
 0x3af   : > { %2001 = vpow2.f32 %v1118_v60  ;;  %v1115_v62 = vsub.f32 %v946_v47, %v1107_v61 }
 0x3b1   : > { %v1120_v63 = vmul.f32 1.442695, %v1115_v62 }
 0x3b2   : > { %v1110_v2 = vpop.xlane.xlu0 %1109 }
 0x3b3   : > { %2003 = vpow2.f32 %v1120_v63  ;;  %v1116_v3 = vsub.f32 %v1022_v50, %v1110_v2 }
 0x3b5   : > { %v1122_v4 = vmul.f32 1.442695, %v1116_v3 }
 0x3b6   : > { %v1113_v5 = vpop.xlane.xlu1 %1112  ;;  %v656_v6 = vpop.permute.xlu0 %655 }
 0x3b7   : > { %2005 = vpow2.f32 %v1122_v4  ;;  %v1117_v15 = vsub.f32 %v1098_v53, %v1113_v5  ;;  %v677_v14 = vcombine.low %v652_v56, %v656_v6  ;;  %v678_v9 = vcombine.high %v652_v56, %v656_v6  ;;  %v1591_v56 = vld [vmem:[#allocation7] sm:$0xff] }
 0x3b9   : > { %v2002_v7 = vpop.eup %2001  ;;  %v1124_v8 = vmul.f32 1.442695, %v1117_v15  ;;  %v685_v17 = vrot.slane %v677_v14, %v2431_v25  ;;  %v692_v18 = vrot.slane %v678_v9, %v2431_v25 }
 0x3ba   : > { %v654_v10 = vpop.permute.xlu1 %653  ;;  %v1126_v11 = vsel %vm797_vm2, %v2002_v7, 0.0 }
 0x3bb   : > { %2007 = vpow2.f32 %v1124_v8  ;;  %v661_v12 = vcombine.low %v650_v57, %v654_v10  ;;  %v662_v13 = vcombine.high %v650_v57, %v654_v10  ;;  %1127 = vadd.xlane.f32.xlu1 %v1126_v11  ;;  %v1592_v57 = vld [vmem:[#allocation7 + $0x8] sm:$0xff] }
 0x3bc   : > { %v1914_v58 = vpack.c.bf16 %v1592_v57, %v1591_v56 }
 0x3bd   : > { %v2004_v16 = vpop.eup %2003  ;;  %v669_v19 = vrot.slane %v661_v12, %v2431_v25  ;;  %v676_v20 = vrot.slane %v662_v13, %v2431_v25 }
 0x3be   : > { %v1129_v21 = vsel %vm797_vm2, %v2004_v16, 0.0 }
 0x3bf   : > { %v693_v22 = vcombine.low %v669_v19, %v685_v17  ;;  %v694_v23 = vcombine.high %v669_v19, %v685_v17  ;;  %v709_v24 = vcombine.low %v676_v20, %v692_v18  ;;  %v710_v26 = vcombine.high %v676_v20, %v692_v18  ;;  %1130 = vadd.xlane.f32.xlu0 %v1129_v21 }
 0x3c1   : > { %v2006_v27 = vpop.eup %2005  ;;  %v701_v28 = vrot.slane %v693_v22, %v2439_v33  ;;  %v708_v29 = vrot.slane %v694_v23, %v2439_v33  ;;  %v717_v30 = vrot.slane %v709_v24, %v2439_v33  ;;  %v724_v31 = vrot.slane %v710_v26, %v2439_v33 }
 0x3c2   : > { %v1132_v32 = vsel %vm797_vm2, %v2006_v27, 0.0 }
 0x3c3   : > { %v729_v34 = vcombine.low %v701_v28, %v708_v29  ;;  %v1797_v35 = vcombine.high %v701_v28, %v708_v29  ;;  %v745_v36 = vcombine.low %v717_v30, %v724_v31  ;;  %v1798_v37 = vcombine.high %v717_v30, %v724_v31  ;;  %1133 = vadd.xlane.f32.xlu0 %v1132_v32  ;;  %v1593_v28 = vld [vmem:[#allocation7 + $0x10] sm:$0xff]  ;;  %v1594_v29 = vld [vmem:[#allocation7 + $0x18] sm:$0xff] }
 0x3c5   : > { %v2008_v38 = vpop.eup %2007  ;;  %v736_v39 = vrot.slane %v729_v34, %v2431_v25  ;;  %v744_v40 = vrot.slane %v1797_v35, %v2431_v25  ;;  %v752_v41 = vrot.slane %v745_v36, %v2431_v25  ;;  %v760_v42 = vrot.slane %v1798_v37, %v2431_v25 }
 0x3c6   : > { %v1135_v43 = vsel %vm797_vm2, %v2008_v38, 0.0  ;;  %v1917_v35 = vpack.c.bf16 %v1594_v29, %v1593_v28 }
 0x3c7   : > { %1136 = vadd.xlane.f32.xlu1 %v1135_v43  ;;  %v761_v44 = vcombine.low %v736_v39, %v744_v40  ;;  %v777_v45 = vcombine.low %v752_v41, %v760_v42  ;;  %v762_v46 = vcombine.high %v736_v39, %v744_v40  ;;  %v778_v47 = vcombine.high %v752_v41, %v760_v42 }
 0x3c9   : > { %v769_v48 = vrot.slane %v761_v44, %v2439_v33  ;;  %v785_v49 = vrot.slane %v777_v45, %v2439_v33  ;;  %v776_v50 = vrot.slane %v762_v46, %v2439_v33  ;;  %v792_v51 = vrot.slane %v778_v47, %v2439_v33 }
 0x3cb   : > { %v793_v52 = vcombine.low %v769_v48, %v785_v49  ;;  %v794_v53 = vcombine.high %v769_v48, %v785_v49  ;;  %v795_v54 = vcombine.low %v776_v50, %v792_v51  ;;  %v796_v55 = vcombine.high %v776_v50, %v792_v51 }
 0x3cd   : > { %1877 = vmatpush3.msra.mxu0 %v793_v52  ;;  %1882 = vmatpush3.msra.mxu1 %v794_v53 }
 0x3ce   : > { %1879 = vmatmul.mubr.msk.f32.vlgmr.msra.gmra.mrb[2].mxu0 %vm797_vm2, %v2002_v7  ;;  %1884 = vmatmul.mubr.msk.f32.vlgmr.msra.gmra.mrb[8].mxu1 %vm797_vm2, %v2004_v16 }
 0x3cf   : > { %1886 = vmatprep.subr.mxu0 %v2182_v1  ;;  %1891 = vmatprep.subr.mxu1 %v2182_v1 }
 0x3d0   : > { %1887 = vmatpush3.msra.mxu0 %v795_v54  ;;  %1892 = vmatpush3.msra.mxu1 %v796_v55 }
 0x3d1   : > { %1888 = vmatprep.mubr.msk.f32.mxu0 %vm2181_vm0, %v2182_v1  ;;  %1893 = vmatprep.mubr.msk.f32.mxu1 %vm2181_vm0, %v2182_v1 }
 0x3d2   : > { %1889 = vmatmul.mubr.msk.f32.vlgmr.msra.gmra.mrb[4].mxu0 %vm797_vm2, %v2006_v27  ;;  %1894 = vmatmul.mubr.msk.f32.vlgmr.msra.gmra.mrb[10].mxu1 %vm797_vm2, %v2008_v38 }
 0x3d3   : > { %1913 = vmatprep.subr.bf16.mxu0 %v2180_v0  ;;  %1904 = vmatprep.mubr.msk.f32.mxu0 %vm2181_vm0, %v2182_v1 }
 0x3d4   : > { %1915 = vmatpush3.bf16.msra.mxu0 %v1914_v58 }
 0x3d5   : > { %1916 = vmatprep.subr.bf16.mxu0 %v2180_v0 }
 0x3d8   : > { %1918 = vmatpush3.bf16.msra.mxu0 %v1917_v35 }
 0x448   : > { %v1128_v60 = vpop.xlane.xlu1 %1127 }
 0x449   : > { %2009 = vrcp.f32 %v1128_v60  ;;  %v1813_v60 = vld [vmem:[%s2606_s4] ss:$0 sm:$0xff] }
 0x44c   : > { %v1131_v59 = vpop.xlane.xlu0 %1130 }
 0x44d   : > { %2011 = vrcp.f32 %v1131_v59 }
 0x450   : > { %v1134_v61 = vpop.xlane.xlu0 %1133 }
 0x451   : > { %2013 = vrcp.f32 %v1134_v61 }
 0x453   : > { %v2010_v3 = vpop.eup %2009 }
 0x454   : > { %v1137_v62 = vpop.xlane.xlu1 %1136 }
 0x455   : > { %2015 = vrcp.f32 %v1137_v62 }
 0x457   : > { %v2012_v1 = vpop.eup %2011 }
 0x45b   : > { %v2014_v6 = vpop.eup %2013 }
 0x45f   : > { %v2016_v15 = vpop.eup %2015 }
 0x4a1   : > { %v1207_v63 = vpop.f32.mrb[2].mxu0  ;;  %v1280_v2 = vpop.f32.mrb[8].mxu1 }
 0x4a2   : > { %v1880_v4 = vpop.f32.mrb[3].mxu0  ;;  %v1885_v5 = vpop.f32.mrb[9].mxu1  ;;  %v1434_v14 = vmul.f32 %v2010_v3, %v1207_v63  ;;  %v1435_v0 = vmul.f32 %v2012_v1, %v1280_v2 }
 0x4a5   : > { %v1353_v7 = vpop.f32.mrb[4].mxu0  ;;  %v1426_v8 = vpop.f32.mrb[10].mxu1 }
 0x4a6   : > { %v1436_v9 = vmul.f32 %v2014_v6, %v1353_v7  ;;  %v1437_v10 = vmul.f32 %v2016_v15, %v1426_v8  ;;  %v1890_v11 = vpop.f32.mrb[5].mxu0  ;;  %v1895_v12 = vpop.f32.mrb[11].mxu1 }
 0x4a8   : > { %v1438_v13 = vcombine.low %v1434_v14, %v1436_v9  ;;  %v1439_v16 = vcombine.high %v1434_v14, %v1436_v9  ;;  %v1454_v17 = vcombine.low %v1435_v0, %v1437_v10  ;;  %v1455_v18 = vcombine.high %v1435_v0, %v1437_v10 }
 0x4aa   : > { %v1446_v19 = vrot.slane %v1438_v13, %v2431_v25  ;;  %v1453_v20 = vrot.slane %v1439_v16, %v2431_v25  ;;  %v1462_v21 = vrot.slane %v1454_v17, %v2431_v25  ;;  %v1469_v22 = vrot.slane %v1455_v18, %v2431_v25 }
 0x4ac   : > { %v1470_v23 = vcombine.low %v1446_v19, %v1462_v21  ;;  %v1471_v24 = vcombine.high %v1446_v19, %v1462_v21  ;;  %v1486_v26 = vcombine.low %v1453_v20, %v1469_v22  ;;  %v1487_v27 = vcombine.high %v1453_v20, %v1469_v22 }
 0x4ae   : > { %v1478_v30 = vrot.slane %v1470_v23, %v2439_v33  ;;  %v1485_v31 = vrot.slane %v1471_v24, %v2439_v33  ;;  %v1494_v32 = vrot.slane %v1486_v26, %v2439_v33  ;;  %v1501_v34 = vrot.slane %v1487_v27, %v2439_v33 }
 0x4b0   : > { %v1506_v36 = vcombine.low %v1478_v30, %v1485_v31  ;;  %v1811_v37 = vcombine.high %v1478_v30, %v1485_v31  ;;  %v1522_v38 = vcombine.low %v1494_v32, %v1501_v34  ;;  %v1812_v39 = vcombine.high %v1494_v32, %v1501_v34 }
 0x4b2   : > { %v1513_v40 = vrot.slane %v1506_v36, %v2431_v25  ;;  %v1521_v41 = vrot.slane %v1811_v37, %v2431_v25  ;;  %v1529_v42 = vrot.slane %v1522_v38, %v2431_v25  ;;  %v1537_v43 = vrot.slane %v1812_v39, %v2431_v25 }
 0x4b4   : > { %v1539_v44 = vcombine.high %v1513_v40, %v1521_v41  ;;  %v1555_v45 = vcombine.high %v1529_v42, %v1537_v43  ;;  %v1538_v46 = vcombine.low %v1513_v40, %v1521_v41  ;;  %v1554_v47 = vcombine.low %v1529_v42, %v1537_v43 }
 0x4b6   : > { %v1553_v48 = vrot.slane %v1539_v44, %v2439_v33  ;;  %v1569_v49 = vrot.slane %v1555_v45, %v2439_v33  ;;  %v1546_v50 = vrot.slane %v1538_v46, %v2439_v33  ;;  %v1562_v51 = vrot.slane %v1554_v47, %v2439_v33 }
 0x4b8   : > { %v1572_v52 = vcombine.low %v1553_v48, %v1569_v49  ;;  %v1571_v53 = vcombine.high %v1546_v50, %v1562_v51  ;;  %v1573_v54 = vcombine.high %v1553_v48, %v1569_v49  ;;  %v1570_v55 = vcombine.low %v1546_v50, %v1562_v51 }
 0x4ba   : > { %1579 = vrot.lane.b32.xlu1 %v1572_v52, %s2190_s6  ;;  %1575 = vrot.lane.b32.xlu0 %v1571_v53, %s2191_s30 }
 0x4be   : > { %1583 = vrot.lane.b32.xlu1 %v1573_v54, %s2192_s15 }
 0x52c   : > { %v1580_v25 = vpop.permute.xlu1 %1579  ;;  %v1576_v56 = vpop.permute.xlu0 %1575 }
 0x52d   : > { %v1586_v57 = vsel %vm797_vm2, %v1570_v55, %v1576_v56 }
 0x52e   : > { %v1588_v58 = vsel %vm1587_vm3, %v1586_v57, %v1580_v25 }
 0x530   : > { %v1584_v33 = vpop.permute.xlu1 %1583 }
 0x531   : > { %v1590_v59 = vsel %vm1589_vm4, %v1588_v58, %v1584_v33 }
 0x532   : > { %1905 = vmatmul.mubr.msk.f32.vlgmr.msra.gmra.mrb[6].mxu0 %vm281_vm1, %v1590_v59 }
 0x605   : > { %v1671_v61 = vpop.f32.mrb[6].mxu0 }
 0x606   : > { %v1672_v62 = vadd.f32 %v1813_v60, %v1671_v61  ;;  %v1906_v63 = vpop.f32.mrb[7].mxu0 }
 0x608   : > { %1675 = vst [vmem:[%s268_s17] sm:$0xff] %v1672_v62 }
 0x609   : > { %2116 = shalt.err (!%p2113_p2)
}
 0x60a   : > { %s2117_s12 = scalar_lea.hbm %s2558_s10, 128  ;;  %s2121_s15 = scalar_lea.hbm %s2607_s5, 256 }
 0x60b   : > { %p2118_p13 = scmp.ne.s32.totalorder %s2558_s10, %s2117_s12  ;;  %p2122_p4 = scmp.lt.u32.totalorder %s2558_s10, %s2607_s5 }
 0x60c   : > { %p2123_p5 = scmp.lt.u32.totalorder %s2121_s15, %s2117_s12  ;;  %p2125_p11 = scmp.lt.u32.totalorder %s2117_s12, %s2558_s10 }
 0x60d   : > { %p2119_p6 = pnand %p2118_p13, %p2621_p0 }
 0x60e   : > { %p2124_p8 = por %p2123_p5, %p2122_p4 }
 0x60f   : > { %p2120_p10 = pneg %p2119_p6 }
 0x610   : > { %p2126_p1 = por %p2125_p11, %p2124_p8 }
 0x612   : > { %p2127_p3 = pnand %p2126_p1, %p2120_p10 }
 0x614   : > { %2130 = shalt.err (!%p2127_p3)
}
 0x615   : > { %1929 = dma.vmem_to_hbm [thread:$0]  (%p2621_p0), %s2560_s24, 128, %s2558_s10, %s1677_s11  }
 0x616 PF: > { %s1702_s29 = sand.u32 1, %s2161_s18   ;;  %p2622_p7 = scmp.ne.s32.totalorder %s2612_s25, 0 }
 0x617   : > { %p2623_p9 = scmp.ge.s32.totalorder %s2173_s21, 2  ;;  %s1703_s17 = scalar_lea.sflag [#allocation4], %s1702_s29 }
 0x619   : > { %p1943_p12 = pnand %p2623_p9, %p2622_p7 }
 0x61b   : > { %2156 = dma.done.wait (!%p1943_p12), %s1703_s17, 128  }
 0x61c   : > { %2158 = vsyncadd (!%p1943_p12), %s1703_s17, 4294967168  ;;  %p19_p2 = scmp.ge.s32.totalorder %s2334_s14, 4   ;;  %s2624_s18 = smov %s2165_s19 }
 0x61d   : > { %s2625_s19 = smov %s2169_s20  ;;  %s2626_s20 = smov %s2350_s27 }
 0x61e   : > { %s2627_s21 = smov %s2334_s14  ;;  %21 = sbr.rel (!%p19_p2) target bundleno = 6 (0x6), region = 93 }
 0x625   :  { %1708 = vsyncpa [#allocation3], 1 }
 0x626   :  { %1710 = vsyncpa [#allocation3 + $0x1], 1 }
 0x627   :  { %1711 = vsyncpa [#allocation6], 1 }
 0x628   :  { %1712 = vsyncpa [#allocation4], 1 }
 0x629   :  { %1714 = vsyncpa [#allocation4 + $0x1], 1 }

</bundles_post_ra>
